<compile_context>
chip_gen: v7x
topology: tpu7x:2x2x1
jax: 0.10.0
libtpu: 0.0.40
codegen_flags: <defaults>
</compile_context>

<pallas_src>
import numpy as np
import jax
import jax.numpy as jnp
from jax.experimental import pallas as pl
from jax.experimental.pallas import tpu as pltpu

PAD = 0          # Constants.PAD
LN_EPS = 1e-3    # classic repo LayerNormalization default eps
NEG_BIG = -1e9


def position_encoding_init(n_position, d_pos_vec):
    """Sinusoid position encoding table (matches the PyTorch helper)."""
    position_enc = np.array(
        [[pos / np.power(10000, 2 * (j // 2) / d_pos_vec) for j in range(d_pos_vec)]
         if pos != 0 else np.zeros(d_pos_vec) for pos in range(n_position)])
    position_enc[1:, 0::2] = np.sin(position_enc[1:, 0::2])
    position_enc[1:, 1::2] = np.cos(position_enc[1:, 1::2])
    return jnp.asarray(position_enc, dtype=jnp.float32)


# ---------------------------------------------------------------------------
# Fused encoder layer kernel: MHA + residual + LN, then FFN + residual + LN.
# Grid over batch; the whole (L, D) activation slab stays in VMEM for the layer.
# ---------------------------------------------------------------------------
def encoder_layer(x, key_bias, layer):
    B, L, D = x.shape
    H, dv, _ = layer["wo"].shape
    Wq = layer["wqkv"].shape[1]
    dk = (Wq - H * dv) // (2 * H)
    Dff = layer["w1"].shape[1]
    Hdk = H * dk
    scale = 1.0 / float(np.sqrt(dk))

    def kernel(x_ref, m_ref, wqkv_ref, wo_ref, bo_ref, g1_ref, bb1_ref,
               w1_ref, b1_ref, w2_ref, b2_ref, g2_ref, bb2_ref, o_ref):

        def layer_norm(z, g, b):
            mu = jnp.mean(z, axis=-1, keepdims=True)
            d = z - mu
            # unbiased variance -> matches torch.std in the reference LayerNormalization
            var = jnp.sum(d * d, axis=-1, keepdims=True) / (D - 1)
            return (d / (jnp.sqrt(var) + LN_EPS)) * g + b

        xb = x_ref[0]                      # (L, D) f32
        bias = m_ref[0]                    # (1, L) f32, -1e9 at PAD keys
        xb_bf = xb.astype(jnp.bfloat16)

        # ---- fused QKV projection: one wide bf16 MXU matmul ----
        qkv = jnp.dot(xb_bf, wqkv_ref[...],
                      preferred_element_type=jnp.float32).astype(jnp.bfloat16)

        # ---- scaled dot-product attention, static unroll over heads ----
        attn = jnp.zeros((L, D), jnp.float32)
        for h in range(H):                                     # H is small & static
            qh = qkv[:, h * dk:(h + 1) * dk]                   # (L, dk) bf16
            kh = qkv[:, Hdk + h * dk: Hdk + (h + 1) * dk]      # (L, dk) bf16
            vh = qkv[:, 2 * Hdk + h * dv: 2 * Hdk + (h + 1) * dv]  # (L, dv) bf16
            s = jnp.dot(qh, kh.T, preferred_element_type=jnp.float32) * scale + bias
            s = s - jnp.max(s, axis=-1, keepdims=True)         # stable softmax (f32)
            e = jnp.exp(s)
            p = e * pl.reciprocal(jnp.sum(e, axis=-1, keepdims=True), approx=True)
            ctx = jnp.dot(p.astype(jnp.bfloat16), vh,
                          preferred_element_type=jnp.float32)  # (L, dv)
            # fold this head's slice of the output projection (no lane-concat of heads)
            attn = attn + jnp.dot(ctx.astype(jnp.bfloat16), wo_ref[h],
                                  preferred_element_type=jnp.float32)

        out1 = layer_norm(attn + bo_ref[...] + xb, g1_ref[...], bb1_ref[...])

        # ---- position-wise FFN (resident in VMEM, no HBM round trip) ----
        hmid = jnp.dot(out1.astype(jnp.bfloat16), w1_ref[...],
                       preferred_element_type=jnp.float32) + b1_ref[...]
        hmid = jnp.maximum(hmid, 0.0)                          # relu
        out2 = jnp.dot(hmid.astype(jnp.bfloat16), w2_ref[...],
                       preferred_element_type=jnp.float32) + b2_ref[...]
        o_ref[0] = layer_norm(out2 + out1, g2_ref[...], bb2_ref[...])

    return pl.pallas_call(
        kernel,
        out_shape=jax.ShapeDtypeStruct((B, L, D), jnp.float32),
        grid=(B,),
        in_specs=[
            pl.BlockSpec((1, L, D), lambda i: (i, 0, 0)),      # x
            pl.BlockSpec((1, 1, L), lambda i: (i, 0, 0)),      # key-pad bias (B,1,L)
            pl.BlockSpec((D, Wq), lambda i: (0, 0)),           # fused Wq|Wk|Wv (bf16)
            pl.BlockSpec((H, dv, D), lambda i: (0, 0, 0)),     # Wo per head (bf16)
            pl.BlockSpec((1, D), lambda i: (0, 0)),            # bo
            pl.BlockSpec((1, D), lambda i: (0, 0)),            # ln1 gamma
            pl.BlockSpec((1, D), lambda i: (0, 0)),            # ln1 beta
            pl.BlockSpec((D, Dff), lambda i: (0, 0)),          # W1 (bf16)
            pl.BlockSpec((1, Dff), lambda i: (0, 0)),          # b1
            pl.BlockSpec((Dff, D), lambda i: (0, 0)),          # W2 (bf16)
            pl.BlockSpec((1, D), lambda i: (0, 0)),            # b2
            pl.BlockSpec((1, D), lambda i: (0, 0)),            # ln2 gamma
            pl.BlockSpec((1, D), lambda i: (0, 0)),            # ln2 beta
        ],
        out_specs=pl.BlockSpec((1, L, D), lambda i: (i, 0, 0)),
        compiler_params=pltpu.CompilerParams(dimension_semantics=("parallel",)),
    )(x, key_bias, layer["wqkv"], layer["wo"], layer["bo"],
      layer["ln1_g"], layer["ln1_b"], layer["w1"], layer["b1"],
      layer["w2"], layer["b2"], layer["ln2_g"], layer["ln2_b"])


# ---------------------------------------------------------------------------
# Parameter init (deterministic) + Encoder forward
# ---------------------------------------------------------------------------
def init_encoder_params(key, n_src_vocab, n_max_seq, n_layers, n_head,
                        d_k, d_v, d_word_vec, d_model, d_inner_hid):
    keys = jax.random.split(key, 1 + 6 * n_layers)

    # src_word_emb: (n_src_vocab, d_word_vec), padding_idx row zeroed
    word_emb = 0.02 * jax.random.normal(keys[0], (n_src_vocab, d_word_vec), jnp.float32)
    word_emb = word_emb.at[PAD].set(0.0)

    # position_enc: sinusoid table (row 0 is zeros)
    pos_enc = position_encoding_init(n_max_seq + 1, d_word_vec)

    layers = []
    for l in range(n_layers):
        kq, kk, kv, ko, k1, k2 = keys[1 + 6 * l: 1 + 6 * (l + 1)]
        # reference-style per-head parameters ...
        wq = 0.1 * jax.random.normal(kq, (n_head, d_model, d_k), jnp.float32)
        wk = 0.1 * jax.random.normal(kk, (n_head, d_model, d_k), jnp.float32)
        wv = 0.1 * jax.random.normal(kv, (n_head, d_model, d_v), jnp.float32)
        wo = 0.1 * jax.random.normal(ko, (n_head * d_v, d_model), jnp.float32)
        w1 = 0.1 * jax.random.normal(k1, (d_model, d_inner_hid), jnp.float32)
        w2 = 0.1 * jax.random.normal(k2, (d_inner_hid, d_model), jnp.float32)
        # ... fused into MXU-friendly bf16 layouts (head-major columns):
        #   x @ wqkv[:, h*dk:(h+1)*dk] == x @ wq[h], etc.
        wqkv = jnp.concatenate(
            [wq.transpose(1, 0, 2).reshape(d_model, n_head * d_k),
             wk.transpose(1, 0, 2).reshape(d_model, n_head * d_k),
             wv.transpose(1, 0, 2).reshape(d_model, n_head * d_v)],
            axis=1).astype(jnp.bfloat16)
        layers.append(dict(
            wqkv=wqkv,
            wo=wo.reshape(n_head, d_v, d_model).astype(jnp.bfloat16),
            bo=jnp.zeros((1, d_model), jnp.float32),
            ln1_g=jnp.ones((1, d_model), jnp.float32),
            ln1_b=jnp.zeros((1, d_model), jnp.float32),
            w1=w1.astype(jnp.bfloat16),
            b1=jnp.zeros((1, d_inner_hid), jnp.float32),
            w2=w2.astype(jnp.bfloat16),
            b2=jnp.zeros((1, d_model), jnp.float32),
            ln2_g=jnp.ones((1, d_model), jnp.float32),
            ln2_b=jnp.zeros((1, d_model), jnp.float32),
        ))
    # NOTE: src_vector_fc / final_fc exist in __init__ but are not exercised by
    # this forward path (int token input; the final_fc branch is `if False`).
    return dict(src_word_emb=word_emb, position_enc=pos_enc, layers=layers)


def encoder_forward(params, src_seq, src_pos=None):
    """src_seq: (B, L) int32 tokens -> (B, L, d_model) float32."""
    B, L = src_seq.shape
    if src_pos is None:
        # matches the provided forward: arange(seq_len), zero-based
        src_pos = jnp.broadcast_to(jnp.arange(L, dtype=jnp.int32)[None, :], (B, L))

    # embedding gathers (glue, plain JAX)
    enc_input = params["src_word_emb"][src_seq] + params["position_enc"][src_pos]

    # get_attn_padding_mask -> additive key bias, (B, 1, L); no (B,L,L) materialization
    key_bias = jnp.where(src_seq == PAD, NEG_BIG, 0.0).astype(jnp.float32)[:, None, :]

    enc_output = enc_input.astype(jnp.float32)
    for layer in params["layers"]:
        enc_output = encoder_layer(enc_output, key_bias, layer)
    return enc_output


if __name__ == "__main__":
    # small, lane-dense, forward-consistent shapes
    B, L = 2, 8                    # batch, n_max_seq
    n_src_vocab = 16
    n_layers, n_head = 2, 4
    d_k = d_v = 32                 # H * d_k = 128 (MXU / lane aligned)
    d_word_vec = d_model = 128
    d_inner_hid = 256

    key = jax.random.PRNGKey(0)
    k_param, k_seq = jax.random.split(key)

    params = init_encoder_params(k_param, n_src_vocab, L, n_layers, n_head,
                                 d_k, d_v, d_word_vec, d_model, d_inner_hid)

    src_seq = jax.random.randint(k_seq, (B, L), 1, n_src_vocab, dtype=jnp.int32)
    src_seq = src_seq.at[:, -2:].set(PAD)   # add some padding to exercise the mask

    out = encoder_forward(params, src_seq)
    out = jax.block_until_ready(out)
    assert out.shape == (B, L, d_model)
    assert bool(jnp.all(jnp.isfinite(out)))
    print("KERNEL_OK")
</pallas_src>

<mosaic_0001>
module attributes {stable_mosaic.version = 11 : i64} {
  func.func @kernel(%arg0: i32, %arg1: memref<1x8x128xf32, #tpu.memory_space<vmem>>, %arg2: memref<1x1x8xf32, #tpu.memory_space<vmem>>, %arg3: memref<128x384xbf16, #tpu.memory_space<vmem>>, %arg4: memref<4x32x128xbf16, #tpu.memory_space<vmem>>, %arg5: memref<1x128xf32, #tpu.memory_space<vmem>>, %arg6: memref<1x128xf32, #tpu.memory_space<vmem>>, %arg7: memref<1x128xf32, #tpu.memory_space<vmem>>, %arg8: memref<128x256xbf16, #tpu.memory_space<vmem>>, %arg9: memref<1x256xf32, #tpu.memory_space<vmem>>, %arg10: memref<256x128xbf16, #tpu.memory_space<vmem>>, %arg11: memref<1x128xf32, #tpu.memory_space<vmem>>, %arg12: memref<1x128xf32, #tpu.memory_space<vmem>>, %arg13: memref<1x128xf32, #tpu.memory_space<vmem>>, %arg14: memref<1x8x128xf32, #tpu.memory_space<vmem>>) attributes {dimension_semantics = [#tpu.dimension_semantics<parallel>], iteration_bounds = array<i64: 2>, scalar_prefetch = 0 : i64, scratch_operands = 0 : i64, tpu.core_type = #tpu.core_type<tc>, window_params = [{transform_indices = @transform_0, window_bounds = array<i64: 1, 8, 128>}, {transform_indices = @transform_1, window_bounds = array<i64: 1, 1, 8>}, {pipeline_mode = #tpu.pipeline_mode<synchronous>, transform_indices = @transform_2, window_bounds = array<i64: 128, 384>}, {pipeline_mode = #tpu.pipeline_mode<synchronous>, transform_indices = @transform_3, window_bounds = array<i64: 4, 32, 128>}, {pipeline_mode = #tpu.pipeline_mode<synchronous>, transform_indices = @transform_4, window_bounds = array<i64: 1, 128>}, {pipeline_mode = #tpu.pipeline_mode<synchronous>, transform_indices = @transform_5, window_bounds = array<i64: 1, 128>}, {pipeline_mode = #tpu.pipeline_mode<synchronous>, transform_indices = @transform_6, window_bounds = array<i64: 1, 128>}, {pipeline_mode = #tpu.pipeline_mode<synchronous>, transform_indices = @transform_7, window_bounds = array<i64: 128, 256>}, {pipeline_mode = #tpu.pipeline_mode<synchronous>, transform_indices = @transform_8, window_bounds = array<i64: 1, 256>}, {pipeline_mode = #tpu.pipeline_mode<synchronous>, transform_indices = @transform_9, window_bounds = array<i64: 256, 128>}, {pipeline_mode = #tpu.pipeline_mode<synchronous>, transform_indices = @transform_10, window_bounds = array<i64: 1, 128>}, {pipeline_mode = #tpu.pipeline_mode<synchronous>, transform_indices = @transform_11, window_bounds = array<i64: 1, 128>}, {pipeline_mode = #tpu.pipeline_mode<synchronous>, transform_indices = @transform_12, window_bounds = array<i64: 1, 128>}, {transform_indices = @transform_13, window_bounds = array<i64: 1, 8, 128>}]} {
    %c0 = arith.constant 0 : index
    %c0_0 = arith.constant 0 : index
    %c0_1 = arith.constant 0 : index
    %0 = vector.load %arg1[%c0, %c0_0, %c0_1] : memref<1x8x128xf32, #tpu.memory_space<vmem>>, vector<1x8x128xf32>
    %1 = vector.shape_cast %0 : vector<1x8x128xf32> to vector<8x128xf32>
    %c0_2 = arith.constant 0 : index
    %c0_3 = arith.constant 0 : index
    %c0_4 = arith.constant 0 : index
    %2 = vector.load %arg2[%c0_2, %c0_3, %c0_4] : memref<1x1x8xf32, #tpu.memory_space<vmem>>, vector<1x1x8xf32>
    %3 = vector.shape_cast %2 : vector<1x1x8xf32> to vector<1x8xf32>
    %4 = arith.truncf %1 : vector<8x128xf32> to vector<8x128xbf16>
    %c0_5 = arith.constant 0 : index
    %c0_6 = arith.constant 0 : index
    %5 = vector.load %arg3[%c0_5, %c0_6] : memref<128x384xbf16, #tpu.memory_space<vmem>>, vector<128x384xbf16>
    %cst = arith.constant dense<0.000000e+00> : vector<8x384xf32>
    %6 = tpu.matmul %4, %5, %cst {dimension_numbers = #tpu.dot_dimension_numbers<[1], [0], [0], [1], [0, 0, 1, 1], [], []>} : vector<8x128xbf16>, vector<128x384xbf16>, vector<8x384xf32> -> vector<8x384xf32>
    %7 = arith.truncf %6 : vector<8x384xf32> to vector<8x384xbf16>
    %cst_7 = arith.constant 0.000000e+00 : f32
    %8 = vector.broadcast %cst_7 : f32 to vector<8x128xf32>
    %9 = vector.extract_strided_slice %7 {offsets = [0, 0], sizes = [8, 32], strides = [1, 1]} : vector<8x384xbf16> to vector<8x32xbf16>
    %10 = vector.extract_strided_slice %7 {offsets = [0, 128], sizes = [8, 32], strides = [1, 1]} : vector<8x384xbf16> to vector<8x32xbf16>
    %11 = vector.extract_strided_slice %7 {offsets = [0, 256], sizes = [8, 32], strides = [1, 1]} : vector<8x384xbf16> to vector<8x32xbf16>
    %12 = tpu.transpose %10, [1, 0] : vector<8x32xbf16> -> vector<32x8xbf16>
    %cst_8 = arith.constant dense<0.000000e+00> : vector<8x8xf32>
    %13 = tpu.matmul %9, %12, %cst_8 {dimension_numbers = #tpu.dot_dimension_numbers<[1], [0], [0], [1], [0, 0, 1, 1], [], []>} : vector<8x32xbf16>, vector<32x8xbf16>, vector<8x8xf32> -> vector<8x8xf32>
    %cst_9 = arith.constant 0.176776692 : f32
    %14 = vector.broadcast %cst_9 : f32 to vector<8x8xf32>
    %15 = arith.mulf %13, %14 : vector<8x8xf32>
    %16 = vector.broadcast %3 : vector<1x8xf32> to vector<8x8xf32>
    %17 = arith.addf %15, %16 : vector<8x8xf32>
    %cst_10 = arith.constant dense<0xFF800000> : vector<8xf32>
    %18 = vector.multi_reduction <maximumf>, %17, %cst_10 [1] : vector<8x8xf32> to vector<8xf32>
    %19 = vector.shape_cast %18 : vector<8xf32> to vector<8x1xf32>
    %20 = vector.broadcast %19 : vector<8x1xf32> to vector<8x8xf32>
    %21 = arith.subf %17, %20 : vector<8x8xf32>
    %22 = math.exp %21 : vector<8x8xf32>
    %cst_11 = arith.constant dense<0.000000e+00> : vector<8xf32>
    %23 = vector.multi_reduction <add>, %22, %cst_11 [1] : vector<8x8xf32> to vector<8xf32>
    %24 = vector.shape_cast %23 : vector<8xf32> to vector<8x1xf32>
    %25 = tpu.reciprocal %24 {approx = true} : vector<8x1xf32> -> vector<8x1xf32>
    %26 = vector.broadcast %25 : vector<8x1xf32> to vector<8x8xf32>
    %27 = arith.mulf %22, %26 : vector<8x8xf32>
    %28 = arith.truncf %27 : vector<8x8xf32> to vector<8x8xbf16>
    %cst_12 = arith.constant dense<0.000000e+00> : vector<8x32xf32>
    %29 = tpu.matmul %28, %11, %cst_12 {dimension_numbers = #tpu.dot_dimension_numbers<[1], [0], [0], [1], [0, 0, 1, 1], [], []>} : vector<8x8xbf16>, vector<8x32xbf16>, vector<8x32xf32> -> vector<8x32xf32>
    %30 = arith.truncf %29 : vector<8x32xf32> to vector<8x32xbf16>
    %c0_13 = arith.constant 0 : index
    %c0_14 = arith.constant 0 : index
    %c0_15 = arith.constant 0 : index
    %31 = vector.load %arg4[%c0_13, %c0_14, %c0_15] : memref<4x32x128xbf16, #tpu.memory_space<vmem>>, vector<1x32x128xbf16>
    %32 = vector.shape_cast %31 : vector<1x32x128xbf16> to vector<32x128xbf16>
    %cst_16 = arith.constant dense<0.000000e+00> : vector<8x128xf32>
    %33 = tpu.matmul %30, %32, %cst_16 {dimension_numbers = #tpu.dot_dimension_numbers<[1], [0], [0], [1], [0, 0, 1, 1], [], []>} : vector<8x32xbf16>, vector<32x128xbf16>, vector<8x128xf32> -> vector<8x128xf32>
    %34 = arith.addf %8, %33 : vector<8x128xf32>
    %35 = vector.extract_strided_slice %7 {offsets = [0, 32], sizes = [8, 32], strides = [1, 1]} : vector<8x384xbf16> to vector<8x32xbf16>
    %36 = vector.extract_strided_slice %7 {offsets = [0, 160], sizes = [8, 32], strides = [1, 1]} : vector<8x384xbf16> to vector<8x32xbf16>
    %37 = vector.extract_strided_slice %7 {offsets = [0, 288], sizes = [8, 32], strides = [1, 1]} : vector<8x384xbf16> to vector<8x32xbf16>
    %38 = tpu.transpose %36, [1, 0] : vector<8x32xbf16> -> vector<32x8xbf16>
    %cst_17 = arith.constant dense<0.000000e+00> : vector<8x8xf32>
    %39 = tpu.matmul %35, %38, %cst_17 {dimension_numbers = #tpu.dot_dimension_numbers<[1], [0], [0], [1], [0, 0, 1, 1], [], []>} : vector<8x32xbf16>, vector<32x8xbf16>, vector<8x8xf32> -> vector<8x8xf32>
    %cst_18 = arith.constant 0.176776692 : f32
    %40 = vector.broadcast %cst_18 : f32 to vector<8x8xf32>
    %41 = arith.mulf %39, %40 : vector<8x8xf32>
    %42 = vector.broadcast %3 : vector<1x8xf32> to vector<8x8xf32>
    %43 = arith.addf %41, %42 : vector<8x8xf32>
    %cst_19 = arith.constant dense<0xFF800000> : vector<8xf32>
    %44 = vector.multi_reduction <maximumf>, %43, %cst_19 [1] : vector<8x8xf32> to vector<8xf32>
    %45 = vector.shape_cast %44 : vector<8xf32> to vector<8x1xf32>
    %46 = vector.broadcast %45 : vector<8x1xf32> to vector<8x8xf32>
    %47 = arith.subf %43, %46 : vector<8x8xf32>
    %48 = math.exp %47 : vector<8x8xf32>
    %cst_20 = arith.constant dense<0.000000e+00> : vector<8xf32>
    %49 = vector.multi_reduction <add>, %48, %cst_20 [1] : vector<8x8xf32> to vector<8xf32>
    %50 = vector.shape_cast %49 : vector<8xf32> to vector<8x1xf32>
    %51 = tpu.reciprocal %50 {approx = true} : vector<8x1xf32> -> vector<8x1xf32>
    %52 = vector.broadcast %51 : vector<8x1xf32> to vector<8x8xf32>
    %53 = arith.mulf %48, %52 : vector<8x8xf32>
    %54 = arith.truncf %53 : vector<8x8xf32> to vector<8x8xbf16>
    %cst_21 = arith.constant dense<0.000000e+00> : vector<8x32xf32>
    %55 = tpu.matmul %54, %37, %cst_21 {dimension_numbers = #tpu.dot_dimension_numbers<[1], [0], [0], [1], [0, 0, 1, 1], [], []>} : vector<8x8xbf16>, vector<8x32xbf16>, vector<8x32xf32> -> vector<8x32xf32>
    %56 = arith.truncf %55 : vector<8x32xf32> to vector<8x32xbf16>
    %c1 = arith.constant 1 : index
    %c0_22 = arith.constant 0 : index
    %c0_23 = arith.constant 0 : index
    %57 = vector.load %arg4[%c1, %c0_22, %c0_23] : memref<4x32x128xbf16, #tpu.memory_space<vmem>>, vector<1x32x128xbf16>
    %58 = vector.shape_cast %57 : vector<1x32x128xbf16> to vector<32x128xbf16>
    %cst_24 = arith.constant dense<0.000000e+00> : vector<8x128xf32>
    %59 = tpu.matmul %56, %58, %cst_24 {dimension_numbers = #tpu.dot_dimension_numbers<[1], [0], [0], [1], [0, 0, 1, 1], [], []>} : vector<8x32xbf16>, vector<32x128xbf16>, vector<8x128xf32> -> vector<8x128xf32>
    %60 = arith.addf %34, %59 : vector<8x128xf32>
    %61 = vector.extract_strided_slice %7 {offsets = [0, 64], sizes = [8, 32], strides = [1, 1]} : vector<8x384xbf16> to vector<8x32xbf16>
    %62 = vector.extract_strided_slice %7 {offsets = [0, 192], sizes = [8, 32], strides = [1, 1]} : vector<8x384xbf16> to vector<8x32xbf16>
    %63 = vector.extract_strided_slice %7 {offsets = [0, 320], sizes = [8, 32], strides = [1, 1]} : vector<8x384xbf16> to vector<8x32xbf16>
    %64 = tpu.transpose %62, [1, 0] : vector<8x32xbf16> -> vector<32x8xbf16>
    %cst_25 = arith.constant dense<0.000000e+00> : vector<8x8xf32>
    %65 = tpu.matmul %61, %64, %cst_25 {dimension_numbers = #tpu.dot_dimension_numbers<[1], [0], [0], [1], [0, 0, 1, 1], [], []>} : vector<8x32xbf16>, vector<32x8xbf16>, vector<8x8xf32> -> vector<8x8xf32>
    %cst_26 = arith.constant 0.176776692 : f32
    %66 = vector.broadcast %cst_26 : f32 to vector<8x8xf32>
    %67 = arith.mulf %65, %66 : vector<8x8xf32>
    %68 = vector.broadcast %3 : vector<1x8xf32> to vector<8x8xf32>
    %69 = arith.addf %67, %68 : vector<8x8xf32>
    %cst_27 = arith.constant dense<0xFF800000> : vector<8xf32>
    %70 = vector.multi_reduction <maximumf>, %69, %cst_27 [1] : vector<8x8xf32> to vector<8xf32>
    %71 = vector.shape_cast %70 : vector<8xf32> to vector<8x1xf32>
    %72 = vector.broadcast %71 : vector<8x1xf32> to vector<8x8xf32>
    %73 = arith.subf %69, %72 : vector<8x8xf32>
    %74 = math.exp %73 : vector<8x8xf32>
    %cst_28 = arith.constant dense<0.000000e+00> : vector<8xf32>
    %75 = vector.multi_reduction <add>, %74, %cst_28 [1] : vector<8x8xf32> to vector<8xf32>
    %76 = vector.shape_cast %75 : vector<8xf32> to vector<8x1xf32>
    %77 = tpu.reciprocal %76 {approx = true} : vector<8x1xf32> -> vector<8x1xf32>
    %78 = vector.broadcast %77 : vector<8x1xf32> to vector<8x8xf32>
    %79 = arith.mulf %74, %78 : vector<8x8xf32>
    %80 = arith.truncf %79 : vector<8x8xf32> to vector<8x8xbf16>
    %cst_29 = arith.constant dense<0.000000e+00> : vector<8x32xf32>
    %81 = tpu.matmul %80, %63, %cst_29 {dimension_numbers = #tpu.dot_dimension_numbers<[1], [0], [0], [1], [0, 0, 1, 1], [], []>} : vector<8x8xbf16>, vector<8x32xbf16>, vector<8x32xf32> -> vector<8x32xf32>
    %82 = arith.truncf %81 : vector<8x32xf32> to vector<8x32xbf16>
    %c2 = arith.constant 2 : index
    %c0_30 = arith.constant 0 : index
    %c0_31 = arith.constant 0 : index
    %83 = vector.load %arg4[%c2, %c0_30, %c0_31] : memref<4x32x128xbf16, #tpu.memory_space<vmem>>, vector<1x32x128xbf16>
    %84 = vector.shape_cast %83 : vector<1x32x128xbf16> to vector<32x128xbf16>
    %cst_32 = arith.constant dense<0.000000e+00> : vector<8x128xf32>
    %85 = tpu.matmul %82, %84, %cst_32 {dimension_numbers = #tpu.dot_dimension_numbers<[1], [0], [0], [1], [0, 0, 1, 1], [], []>} : vector<8x32xbf16>, vector<32x128xbf16>, vector<8x128xf32> -> vector<8x128xf32>
    %86 = arith.addf %60, %85 : vector<8x128xf32>
    %87 = vector.extract_strided_slice %7 {offsets = [0, 96], sizes = [8, 32], strides = [1, 1]} : vector<8x384xbf16> to vector<8x32xbf16>
    %88 = vector.extract_strided_slice %7 {offsets = [0, 224], sizes = [8, 32], strides = [1, 1]} : vector<8x384xbf16> to vector<8x32xbf16>
    %89 = vector.extract_strided_slice %7 {offsets = [0, 352], sizes = [8, 32], strides = [1, 1]} : vector<8x384xbf16> to vector<8x32xbf16>
    %90 = tpu.transpose %88, [1, 0] : vector<8x32xbf16> -> vector<32x8xbf16>
    %cst_33 = arith.constant dense<0.000000e+00> : vector<8x8xf32>
    %91 = tpu.matmul %87, %90, %cst_33 {dimension_numbers = #tpu.dot_dimension_numbers<[1], [0], [0], [1], [0, 0, 1, 1], [], []>} : vector<8x32xbf16>, vector<32x8xbf16>, vector<8x8xf32> -> vector<8x8xf32>
    %cst_34 = arith.constant 0.176776692 : f32
    %92 = vector.broadcast %cst_34 : f32 to vector<8x8xf32>
    %93 = arith.mulf %91, %92 : vector<8x8xf32>
    %94 = vector.broadcast %3 : vector<1x8xf32> to vector<8x8xf32>
    %95 = arith.addf %93, %94 : vector<8x8xf32>
    %cst_35 = arith.constant dense<0xFF800000> : vector<8xf32>
    %96 = vector.multi_reduction <maximumf>, %95, %cst_35 [1] : vector<8x8xf32> to vector<8xf32>
    %97 = vector.shape_cast %96 : vector<8xf32> to vector<8x1xf32>
    %98 = vector.broadcast %97 : vector<8x1xf32> to vector<8x8xf32>
    %99 = arith.subf %95, %98 : vector<8x8xf32>
    %100 = math.exp %99 : vector<8x8xf32>
    %cst_36 = arith.constant dense<0.000000e+00> : vector<8xf32>
    %101 = vector.multi_reduction <add>, %100, %cst_36 [1] : vector<8x8xf32> to vector<8xf32>
    %102 = vector.shape_cast %101 : vector<8xf32> to vector<8x1xf32>
    %103 = tpu.reciprocal %102 {approx = true} : vector<8x1xf32> -> vector<8x1xf32>
    %104 = vector.broadcast %103 : vector<8x1xf32> to vector<8x8xf32>
    %105 = arith.mulf %100, %104 : vector<8x8xf32>
    %106 = arith.truncf %105 : vector<8x8xf32> to vector<8x8xbf16>
    %cst_37 = arith.constant dense<0.000000e+00> : vector<8x32xf32>
    %107 = tpu.matmul %106, %89, %cst_37 {dimension_numbers = #tpu.dot_dimension_numbers<[1], [0], [0], [1], [0, 0, 1, 1], [], []>} : vector<8x8xbf16>, vector<8x32xbf16>, vector<8x32xf32> -> vector<8x32xf32>
    %108 = arith.truncf %107 : vector<8x32xf32> to vector<8x32xbf16>
    %c3 = arith.constant 3 : index
    %c0_38 = arith.constant 0 : index
    %c0_39 = arith.constant 0 : index
    %109 = vector.load %arg4[%c3, %c0_38, %c0_39] : memref<4x32x128xbf16, #tpu.memory_space<vmem>>, vector<1x32x128xbf16>
    %110 = vector.shape_cast %109 : vector<1x32x128xbf16> to vector<32x128xbf16>
    %cst_40 = arith.constant dense<0.000000e+00> : vector<8x128xf32>
    %111 = tpu.matmul %108, %110, %cst_40 {dimension_numbers = #tpu.dot_dimension_numbers<[1], [0], [0], [1], [0, 0, 1, 1], [], []>} : vector<8x32xbf16>, vector<32x128xbf16>, vector<8x128xf32> -> vector<8x128xf32>
    %112 = arith.addf %86, %111 : vector<8x128xf32>
    %c0_41 = arith.constant 0 : index
    %c0_42 = arith.constant 0 : index
    %113 = vector.load %arg5[%c0_41, %c0_42] : memref<1x128xf32, #tpu.memory_space<vmem>>, vector<1x128xf32>
    %114 = vector.broadcast %113 : vector<1x128xf32> to vector<8x128xf32>
    %115 = arith.addf %112, %114 : vector<8x128xf32>
    %116 = arith.addf %115, %1 : vector<8x128xf32>
    %c0_43 = arith.constant 0 : index
    %c0_44 = arith.constant 0 : index
    %117 = vector.load %arg6[%c0_43, %c0_44] : memref<1x128xf32, #tpu.memory_space<vmem>>, vector<1x128xf32>
    %c0_45 = arith.constant 0 : index
    %c0_46 = arith.constant 0 : index
    %118 = vector.load %arg7[%c0_45, %c0_46] : memref<1x128xf32, #tpu.memory_space<vmem>>, vector<1x128xf32>
    %cst_47 = arith.constant dense<0.000000e+00> : vector<8xf32>
    %119 = vector.multi_reduction <add>, %116, %cst_47 [1] : vector<8x128xf32> to vector<8xf32>
    %120 = vector.shape_cast %119 : vector<8xf32> to vector<8x1xf32>
    %cst_48 = arith.constant 1.280000e+02 : f32
    %121 = vector.broadcast %cst_48 : f32 to vector<8x1xf32>
    %122 = arith.divf %120, %121 : vector<8x1xf32>
    %123 = vector.broadcast %122 : vector<8x1xf32> to vector<8x128xf32>
    %124 = arith.subf %116, %123 : vector<8x128xf32>
    %125 = arith.mulf %124, %124 : vector<8x128xf32>
    %cst_49 = arith.constant dense<0.000000e+00> : vector<8xf32>
    %126 = vector.multi_reduction <add>, %125, %cst_49 [1] : vector<8x128xf32> to vector<8xf32>
    %127 = vector.shape_cast %126 : vector<8xf32> to vector<8x1xf32>
    %cst_50 = arith.constant 1.270000e+02 : f32
    %128 = vector.broadcast %cst_50 : f32 to vector<8x1xf32>
    %129 = arith.divf %127, %128 : vector<8x1xf32>
    %130 = math.sqrt %129 : vector<8x1xf32>
    %cst_51 = arith.constant 1.000000e-03 : f32
    %131 = vector.broadcast %cst_51 : f32 to vector<8x1xf32>
    %132 = arith.addf %130, %131 : vector<8x1xf32>
    %133 = vector.broadcast %132 : vector<8x1xf32> to vector<8x128xf32>
    %134 = arith.divf %124, %133 : vector<8x128xf32>
    %135 = vector.broadcast %117 : vector<1x128xf32> to vector<8x128xf32>
    %136 = arith.mulf %134, %135 : vector<8x128xf32>
    %137 = vector.broadcast %118 : vector<1x128xf32> to vector<8x128xf32>
    %138 = arith.addf %136, %137 : vector<8x128xf32>
    %139 = arith.truncf %138 : vector<8x128xf32> to vector<8x128xbf16>
    %c0_52 = arith.constant 0 : index
    %c0_53 = arith.constant 0 : index
    %140 = vector.load %arg8[%c0_52, %c0_53] : memref<128x256xbf16, #tpu.memory_space<vmem>>, vector<128x256xbf16>
    %cst_54 = arith.constant dense<0.000000e+00> : vector<8x256xf32>
    %141 = tpu.matmul %139, %140, %cst_54 {dimension_numbers = #tpu.dot_dimension_numbers<[1], [0], [0], [1], [0, 0, 1, 1], [], []>} : vector<8x128xbf16>, vector<128x256xbf16>, vector<8x256xf32> -> vector<8x256xf32>
    %c0_55 = arith.constant 0 : index
    %c0_56 = arith.constant 0 : index
    %142 = vector.load %arg9[%c0_55, %c0_56] : memref<1x256xf32, #tpu.memory_space<vmem>>, vector<1x256xf32>
    %143 = vector.broadcast %142 : vector<1x256xf32> to vector<8x256xf32>
    %144 = arith.addf %141, %143 : vector<8x256xf32>
    %cst_57 = arith.constant 0.000000e+00 : f32
    %145 = vector.broadcast %cst_57 : f32 to vector<8x256xf32>
    %146 = arith.maximumf %144, %145 : vector<8x256xf32>
    %147 = arith.truncf %146 : vector<8x256xf32> to vector<8x256xbf16>
    %c0_58 = arith.constant 0 : index
    %c0_59 = arith.constant 0 : index
    %148 = vector.load %arg10[%c0_58, %c0_59] : memref<256x128xbf16, #tpu.memory_space<vmem>>, vector<256x128xbf16>
    %cst_60 = arith.constant dense<0.000000e+00> : vector<8x128xf32>
    %149 = tpu.matmul %147, %148, %cst_60 {dimension_numbers = #tpu.dot_dimension_numbers<[1], [0], [0], [1], [0, 0, 1, 1], [], []>} : vector<8x256xbf16>, vector<256x128xbf16>, vector<8x128xf32> -> vector<8x128xf32>
    %c0_61 = arith.constant 0 : index
    %c0_62 = arith.constant 0 : index
    %150 = vector.load %arg11[%c0_61, %c0_62] : memref<1x128xf32, #tpu.memory_space<vmem>>, vector<1x128xf32>
    %151 = vector.broadcast %150 : vector<1x128xf32> to vector<8x128xf32>
    %152 = arith.addf %149, %151 : vector<8x128xf32>
    %153 = arith.addf %152, %138 : vector<8x128xf32>
    %c0_63 = arith.constant 0 : index
    %c0_64 = arith.constant 0 : index
    %154 = vector.load %arg12[%c0_63, %c0_64] : memref<1x128xf32, #tpu.memory_space<vmem>>, vector<1x128xf32>
    %c0_65 = arith.constant 0 : index
    %c0_66 = arith.constant 0 : index
    %155 = vector.load %arg13[%c0_65, %c0_66] : memref<1x128xf32, #tpu.memory_space<vmem>>, vector<1x128xf32>
    %cst_67 = arith.constant dense<0.000000e+00> : vector<8xf32>
    %156 = vector.multi_reduction <add>, %153, %cst_67 [1] : vector<8x128xf32> to vector<8xf32>
    %157 = vector.shape_cast %156 : vector<8xf32> to vector<8x1xf32>
    %cst_68 = arith.constant 1.280000e+02 : f32
    %158 = vector.broadcast %cst_68 : f32 to vector<8x1xf32>
    %159 = arith.divf %157, %158 : vector<8x1xf32>
    %160 = vector.broadcast %159 : vector<8x1xf32> to vector<8x128xf32>
    %161 = arith.subf %153, %160 : vector<8x128xf32>
    %162 = arith.mulf %161, %161 : vector<8x128xf32>
    %cst_69 = arith.constant dense<0.000000e+00> : vector<8xf32>
    %163 = vector.multi_reduction <add>, %162, %cst_69 [1] : vector<8x128xf32> to vector<8xf32>
    %164 = vector.shape_cast %163 : vector<8xf32> to vector<8x1xf32>
    %cst_70 = arith.constant 1.270000e+02 : f32
    %165 = vector.broadcast %cst_70 : f32 to vector<8x1xf32>
    %166 = arith.divf %164, %165 : vector<8x1xf32>
    %167 = math.sqrt %166 : vector<8x1xf32>
    %cst_71 = arith.constant 1.000000e-03 : f32
    %168 = vector.broadcast %cst_71 : f32 to vector<8x1xf32>
    %169 = arith.addf %167, %168 : vector<8x1xf32>
    %170 = vector.broadcast %169 : vector<8x1xf32> to vector<8x128xf32>
    %171 = arith.divf %161, %170 : vector<8x128xf32>
    %172 = vector.broadcast %154 : vector<1x128xf32> to vector<8x128xf32>
    %173 = arith.mulf %171, %172 : vector<8x128xf32>
    %174 = vector.broadcast %155 : vector<1x128xf32> to vector<8x128xf32>
    %175 = arith.addf %173, %174 : vector<8x128xf32>
    %c0_72 = arith.constant 0 : index
    %c0_73 = arith.constant 0 : index
    %c0_74 = arith.constant 0 : index
    %176 = vector.load %arg14[%c0_72, %c0_73, %c0_74] : memref<1x8x128xf32, #tpu.memory_space<vmem>>, vector<1x8x128xf32>
    %177 = vector.shape_cast %176 : vector<1x8x128xf32> to vector<8x128xf32>
    %178 = vector.shape_cast %175 : vector<8x128xf32> to vector<1x8x128xf32>
    tpu.vector_store %arg14[%c0_72, %c0_73, %c0_74], %178 {strides = array<i32>} : memref<1x8x128xf32, #tpu.memory_space<vmem>>, vector<1x8x128xf32>,
    return
  }
  func.func @transform_0(%arg0: i32) -> (i32, i32, i32) {
    %c0_i32 = arith.constant 0 : i32
    %c0_i32_0 = arith.constant 0 : i32
    %c0_i32_1 = arith.constant 0 : i32
    return %arg0, %c0_i32, %c0_i32_0 : i32, i32, i32
  }
  func.func @transform_1(%arg0: i32) -> (i32, i32, i32) {
    %c0_i32 = arith.constant 0 : i32
    %c0_i32_0 = arith.constant 0 : i32
    %c0_i32_1 = arith.constant 0 : i32
    return %arg0, %c0_i32, %c0_i32_0 : i32, i32, i32
  }
  func.func @transform_2(%arg0: i32) -> (i32, i32) {
    %c0_i32 = arith.constant 0 : i32
    %c0_i32_0 = arith.constant 0 : i32
    %c0_i32_1 = arith.constant 0 : i32
    return %c0_i32, %c0_i32_0 : i32, i32
  }
  func.func @transform_3(%arg0: i32) -> (i32, i32, i32) {
    %c0_i32 = arith.constant 0 : i32
    %c0_i32_0 = arith.constant 0 : i32
    %c0_i32_1 = arith.constant 0 : i32
    %c0_i32_2 = arith.constant 0 : i32
    return %c0_i32, %c0_i32_0, %c0_i32_1 : i32, i32, i32
  }
  func.func @transform_4(%arg0: i32) -> (i32, i32) {
    %c0_i32 = arith.constant 0 : i32
    %c0_i32_0 = arith.constant 0 : i32
    %c0_i32_1 = arith.constant 0 : i32
    return %c0_i32, %c0_i32_0 : i32, i32
  }
  func.func @transform_5(%arg0: i32) -> (i32, i32) {
    %c0_i32 = arith.constant 0 : i32
    %c0_i32_0 = arith.constant 0 : i32
    %c0_i32_1 = arith.constant 0 : i32
    return %c0_i32, %c0_i32_0 : i32, i32
  }
  func.func @transform_6(%arg0: i32) -> (i32, i32) {
    %c0_i32 = arith.constant 0 : i32
    %c0_i32_0 = arith.constant 0 : i32
    %c0_i32_1 = arith.constant 0 : i32
    return %c0_i32, %c0_i32_0 : i32, i32
  }
  func.func @transform_7(%arg0: i32) -> (i32, i32) {
    %c0_i32 = arith.constant 0 : i32
    %c0_i32_0 = arith.constant 0 : i32
    %c0_i32_1 = arith.constant 0 : i32
    return %c0_i32, %c0_i32_0 : i32, i32
  }
  func.func @transform_8(%arg0: i32) -> (i32, i32) {
    %c0_i32 = arith.constant 0 : i32
    %c0_i32_0 = arith.constant 0 : i32
    %c0_i32_1 = arith.constant 0 : i32
    return %c0_i32, %c0_i32_0 : i32, i32
  }
  func.func @transform_9(%arg0: i32) -> (i32, i32) {
    %c0_i32 = arith.constant 0 : i32
    %c0_i32_0 = arith.constant 0 : i32
    %c0_i32_1 = arith.constant 0 : i32
    return %c0_i32, %c0_i32_0 : i32, i32
  }
  func.func @transform_10(%arg0: i32) -> (i32, i32) {
    %c0_i32 = arith.constant 0 : i32
    %c0_i32_0 = arith.constant 0 : i32
    %c0_i32_1 = arith.constant 0 : i32
    return %c0_i32, %c0_i32_0 : i32, i32
  }
  func.func @transform_11(%arg0: i32) -> (i32, i32) {
    %c0_i32 = arith.constant 0 : i32
    %c0_i32_0 = arith.constant 0 : i32
    %c0_i32_1 = arith.constant 0 : i32
    return %c0_i32, %c0_i32_0 : i32, i32
  }
  func.func @transform_12(%arg0: i32) -> (i32, i32) {
    %c0_i32 = arith.constant 0 : i32
    %c0_i32_0 = arith.constant 0 : i32
    %c0_i32_1 = arith.constant 0 : i32
    return %c0_i32, %c0_i32_0 : i32, i32
  }
  func.func @transform_13(%arg0: i32) -> (i32, i32, i32) {
    %c0_i32 = arith.constant 0 : i32
    %c0_i32_0 = arith.constant 0 : i32
    %c0_i32_1 = arith.constant 0 : i32
    return %arg0, %c0_i32, %c0_i32_0 : i32, i32, i32
  }
}

</mosaic_0001>

<bundles_post_ra>
// kernel: tpu_custom_call.1
= control target key start
LH: loop header
LB: loop body
LE: loop exit
PB: predicated region body
PF: predicated region fallthrough
CT: control target
= control target key end

     0   :  { %s3219_s0 = inlined_call_operand.hbm [shape: f32[2,8,128], index: 0, kind: input, shape index: {}]   ;;  %s3220_s1 = inlined_call_operand.vmem [shape: f32[2,1,8], index: 1, kind: input, shape index: {}]   ;;  %s3221_s2 = inlined_call_operand.hbm [shape: bf16[128,384], index: 2, kind: input, shape index: {}]   ;;  %s3222_s3 = inlined_call_operand.hbm [shape: bf16[4,32,128], index: 3, kind: input, shape index: {}]   ;;  %s3223_s4 = inlined_call_operand.vmem [shape: f32[1,128], index: 4, kind: input, shape index: {}]   ;;  %s3224_s5 = inlined_call_operand.vmem [shape: f32[1,128], index: 5, kind: input, shape index: {}]   ;;  %s3225_s6 = inlined_call_operand.vmem [shape: f32[1,128], index: 6, kind: input, shape index: {}]   ;;  %s3226_s7 = inlined_call_operand.hbm [shape: bf16[128,256], index: 7, kind: input, shape index: {}]   ;;  %s3227_s8 = inlined_call_operand.vmem [shape: f32[1,256], index: 8, kind: input, shape index: {}]   ;;  %s3228_s9 = inlined_call_operand.hbm [shape: bf16[256,128], index: 9, kind: input, shape index: {}]   ;;  %s3229_s10 = inlined_call_operand.vmem [shape: f32[1,128], index: 10, kind: input, shape index: {}]   ;;  %s3230_s11 = inlined_call_operand.vmem [shape: f32[1,128], index: 11, kind: input, shape index: {}]   ;;  %s3231_s12 = inlined_call_operand.vmem [shape: f32[1,128], index: 12, kind: input, shape index: {}]   ;;  %s3232_s13 = inlined_call_operand.hbm [shape: f32[2,8,128], index: 13, kind: output, shape index: {}]  }
   0x1   :  { %3237 = sst [smem:[#allocation16_spill]] %s3219_s0 }
   0x2   :  { %3238 = sst [smem:[#allocation17_spill]] %s3221_s2 }
   0x3   :  { %3239 = sst [smem:[#allocation18_spill]] %s3227_s8 }
   0x4   :  { %3240 = sst [smem:[#allocation19_spill]] %s3229_s10 }
   0x5   :  { %3241 = sst [smem:[#allocation20_spill]] %s3230_s11 }
   0x6   :  { %3242 = sst [smem:[#allocation21_spill]] %s3231_s12 }
   0x7   :  { %3243 = sst [smem:[#allocation22_spill]] %s3232_s13 }
   0x8   :  { %18 = vsyncpa [#allocation3], 0 }
   0x9   :  { %20 = vsyncpa [#allocation3 + $0x1], 0 }
   0xa   :  { %21 = vsyncpa [#allocation6], 0 }
   0xb   :  { %22 = vsyncpa [#allocation9], 0 }
   0xc   :  { %23 = vsyncpa [#allocation4], 0 }
   0xd   :  { %25 = vsyncpa [#allocation4 + $0x1], 0  ;;  %s2787_s25 = smov 0   ;;  %s2789_s26 = smov 0  }
   0xe   :  { %s2791_s27 = smov 0   ;;  %s2793_s28 = smov 0  }
   0xf LB: > { %s2699_s29 = smov [#allocation5]   ;;  %s2808_s14 = sadd.s32 4294967295, %s2697_s28   ;;  %s2697_s28 = sphi %s2793_s28, %s3271_s28   ;;  %s2693_s27 = sphi %s2791_s27, %s3270_s27   ;;  %s2689_s26 = sphi %s2789_s26, %s3269_s26   ;;  %s2685_s25 = sphi %s2787_s25, %s3268_s25  }
  0x10   : > { %s357_s30 = sshll.u32 %s2699_s29, 4  ;;  %p2017_p0 = scmp.ge.s32.totalorder %s2697_s28, 1  ;;  %s2813_s30 = int_to_ptr.vmem [resolvable:$true] %s357_s30 }
  0x11   : > { %p3234_p1 = scmp.eq.s32.totalorder %s2808_s14, 0  ;;  %p345_p2 = scmp.lt.s32.totalorder %s2697_s28, 3 }
  0x12   : > { %s2700_s16 = smov [#allocation8]   ;;  %s2701_s19 = smov [#allocation7]  }
  0x13   : > { %p2815_p3 = pnand %p2017_p0, %p345_p2  ;;  %s392_s17 = sshll.u32 %s2700_s16, 4  ;;  %s2828_s17 = int_to_ptr.vmem [resolvable:$true] %s392_s17 }
  0x14   : > { %s2830_s20 = sshll.u32 %s2701_s19, 4  ;;  %s3246_s2 = sld [smem:[#allocation17_spill]]  ;;  %s371_s20 = int_to_ptr.vmem [resolvable:$true] %s2830_s20 }
  0x15   : > { %s3244_s15 = scalar_select %p2815_p3, 1, 0 }
  0x16   : > { %p2298_p5 = pneg %p2815_p3 }
  0x18   : > { %p2824_p6 = pnand %p2298_p5, %p3234_p1 }
  0x1a   : > { %s2481_s23 = scalar_lea.hbm %s3246_s2, 3072  ;;  %p2840_p8 = pneg %p2824_p6 }
  0x1b   : > { %p2482_p7 = scmp.ne.s32.totalorder %s3246_s2, %s2481_s23  ;;  %p2488_p11 = scmp.lt.u32.totalorder %s2481_s23, %s3246_s2 }
  0x1d   : > { %p2484_p9 = pnand %p2840_p8, %p2482_p7 }
  0x1f   : > { %p2485_p10 = pneg %p2484_p9 }
  0x21   : > { %p2490_p12 = pnand %p2488_p11, %p2485_p10 }
  0x23   : > { %2493 = shalt.err (!%p2490_p12)
}
  0x24   : > { %s2494_s21 = scalar_lea.vmem %s2813_s30, 3072  ;;  %p2502_p5 = scmp.lt.s32.totalorder %s2813_s30, %s2813_s30 }
  0x25   : > { %p2495_p13 = scmp.ne.s32.totalorder %s2813_s30, %s2494_s21  ;;  %p2503_p4 = scmp.lt.s32.totalorder %s2494_s21, %s2494_s21 }
  0x27   : > { %p2497_p0 = pnand %p2495_p13, %p2840_p8  ;;  %p2504_p7 = por %p2503_p4, %p2502_p5 }
  0x29   : > { %p2498_p2 = pneg %p2497_p0 }
  0x2b   : > { %p2505_p9 = pnand %p2504_p7, %p2498_p2 }
  0x2d   : > { %2508 = shalt.err (!%p2505_p9)
}
  0x2e   : > { %s2702_s22 = smov 192   ;;  %s2703_s13 = smov 12  }
  0x2f   : > { %2301 = dma.hbm_to_vmem [thread:$0]  (!%p2824_p6), %s3246_s2, 3072, %s2813_s30, [#allocation6], %s2702_s22, %s2702_s22, %s2703_s13  }
  0x30   : > { %s2509_s12 = scalar_lea.hbm %s3226_s7, 2048 }
  0x31   : > { %p2510_p4 = scmp.ne.s32.totalorder %s3226_s7, %s2509_s12  ;;  %p2516_p12 = scmp.lt.u32.totalorder %s2509_s12, %s3226_s7 }
  0x33   : > { %p2512_p10 = pnand %p2510_p4, %p2840_p8 }
  0x35   : > { %p2513_p11 = pneg %p2512_p10 }
  0x37   : > { %p2518_p13 = pnand %p2516_p12, %p2513_p11 }
  0x39   : > { %2521 = shalt.err (!%p2518_p13)
}
  0x3a   : > { %s2522_s30 = scalar_lea.vmem %s2828_s17, 2048  ;;  %p2530_p7 = scmp.lt.s32.totalorder %s2828_s17, %s2828_s17 }
  0x3b   : > { %p2523_p0 = scmp.ne.s32.totalorder %s2828_s17, %s2522_s30  ;;  %p2531_p9 = scmp.lt.s32.totalorder %s2522_s30, %s2522_s30 }
  0x3d   : > { %p2525_p2 = pnand %p2523_p0, %p2840_p8  ;;  %p2532_p4 = por %p2531_p9, %p2530_p7 }
  0x3f   : > { %p2526_p5 = pneg %p2525_p2 }
  0x41   : > { %p2533_p10 = pnand %p2532_p4, %p2526_p5 }
  0x43   : > { %2536 = shalt.err (!%p2533_p10)
}
  0x44   : > { %s2704_s10 = smov 128   ;;  %s2705_s8 = smov 8  }
  0x45   : > { %2307 = dma.hbm_to_vmem [thread:$0]  (!%p2824_p6), %s3226_s7, 2048, %s2828_s17, [#allocation9], %s2704_s10, %s2704_s10, %s2705_s8  }
  0x46   : > { %s2537_s23 = scalar_lea.hbm %s3222_s3, 1024 }
  0x47   : > { %p2538_p11 = scmp.ne.s32.totalorder %s3222_s3, %s2537_s23  ;;  %p2544_p0 = scmp.lt.u32.totalorder %s2537_s23, %s3222_s3 }
  0x49   : > { %p2540_p12 = pnand %p2538_p11, %p2840_p8 }
  0x4b   : > { %p2541_p13 = pneg %p2540_p12 }
  0x4d   : > { %p2546_p2 = pnand %p2544_p0, %p2541_p13 }
  0x4f   : > { %2549 = shalt.err (!%p2546_p2)
}
  0x50   : > { %s2550_s30 = scalar_lea.vmem %s371_s20, 1024  ;;  %p2558_p4 = scmp.lt.s32.totalorder %s371_s20, %s371_s20 }
  0x51   : > { %p2551_p5 = scmp.ne.s32.totalorder %s371_s20, %s2550_s30  ;;  %p2559_p10 = scmp.lt.s32.totalorder %s2550_s30, %s2550_s30 }
  0x53   : > { %p2553_p7 = pnand %p2551_p5, %p2840_p8  ;;  %p2560_p1 = por %p2559_p10, %p2558_p4 }
  0x55   : > { %p2554_p9 = pneg %p2553_p7 }
  0x57   : > { %p2561_p3 = pnand %p2560_p1, %p2554_p9 }
  0x59   : > { %2564 = shalt.err (!%p2561_p3)
}
  0x5a   : > { %s2706_s17 = smov 64   ;;  %s2707_s10 = smov 4  }
  0x5b   : > { %2304 = dma.hbm_to_vmem [thread:$0]  (!%p2824_p6), %s3222_s3, 1024, %s371_s20, [#allocation6], %s2706_s17, %s2706_s17, %s2707_s10  }
  0x5c   : > { %s2708_s12 = smov [#allocation10]   ;;  %s2565_s24 = scalar_lea.hbm %s3228_s9, 2048 }
  0x5d   : > { %s408_s22 = sshll.u32 %s2708_s12, 4  ;;  %p2566_p1 = scmp.ne.s32.totalorder %s3228_s9, %s2565_s24  ;;  %s409_s22 = int_to_ptr.vmem [resolvable:$true] %s408_s22 }
  0x5e   : > { %p2572_p12 = scmp.lt.u32.totalorder %s2565_s24, %s3228_s9 }
  0x5f   : > { %p2568_p3 = pnand %p2566_p1, %p2840_p8 }
  0x61   : > { %p2569_p11 = pneg %p2568_p3 }
  0x63   : > { %p2574_p13 = pnand %p2572_p12, %p2569_p11 }
  0x65   : > { %2577 = shalt.err (!%p2574_p13)
}
  0x66   : > { %s2578_s20 = scalar_lea.vmem %s409_s22, 2048  ;;  %p2586_p7 = scmp.lt.s32.totalorder %s409_s22, %s409_s22 }
  0x67   : > { %p2579_p0 = scmp.ne.s32.totalorder %s409_s22, %s2578_s20  ;;  %p2587_p9 = scmp.lt.s32.totalorder %s2578_s20, %s2578_s20 }
  0x69   : > { %p2581_p2 = pnand %p2579_p0, %p2840_p8  ;;  %p2588_p4 = por %p2587_p9, %p2586_p7 }
  0x6b   : > { %p2582_p5 = pneg %p2581_p2 }
  0x6d   : > { %p2589_p10 = pnand %p2588_p4, %p2582_p5 }
  0x6f   : > { %2592 = shalt.err (!%p2589_p10)
}
  0x70   : > { %2310 = dma.hbm_to_vmem [thread:$0]  (!%p2824_p6), %s3228_s9, 2048, %s409_s22, [#allocation9], %s2706_s17, %s2706_s17, %s2707_s10  }
  0x71   : > { %s2016_s16 = sadd.s32 4294967294, %s2697_s28   ;;  %s2923_s18 = sadd.s32 1, %s2697_s28  }
  0x72   : > { %s35_s12 = ssub.s32 %s2697_s28, %s2923_s18  ;;  %s38_s13 = sadd.s32 1, %s2693_s27 }
  0x73   : > { %p36_p8 = scmp.eq.s32.totalorder %s35_s12, 0  ;;  %p45_p1 = scmp.ne.s32.totalorder %s2693_s27, %s2689_s26 }
  0x74   : > { %p46_p3 = scmp.eq.s32.totalorder %s2697_s28, 0  ;;  %p51_p11 = scmp.ne.s32.totalorder %s2689_s26, %s2685_s25 }
  0x75   : > { %s2934_s23 = scalar_select %p36_p8, %s2693_s27, %s38_s13  }
  0x76   : > { %p2936_p12 = por %p46_p3, %p45_p1  ;;  %p3249_p13 = scmp.eq.s32.totalorder %s2808_s14, 0 }
  0x77   : > { %p332_p0 = scmp.eq.s32.totalorder %s2808_s14, 1  ;;  %p338_p2 = scmp.eq.s32.totalorder %s2016_s16, 1 }
  0x78   : > { %p2942_p6 = por %p3249_p13, %p51_p11  ;;  %p2323_p5 = scmp.lt.s32.totalorder %s2697_s28, 2 }
  0x79   : > { %s431_s10 = sand.u32 1, %s2693_s27   ;;  %p2949_p7 = por %p332_p0, %p45_p1 }
  0x7a   : > { %p2953_p9 = por %p338_p2, %p51_p11  ;;  %s2023_s19 = sshll.u32 %s431_s10, 3 }
  0x7b   : > { %s3251_s22 = scalar_select %p2949_p7, 1, 0 }
  0x7c   : > { %s3252_s29 = scalar_select %p2953_p9, 1, 0 }
  0x7d   : > { %s2024_s21 = sshll.u32 %s2697_s28, 7  ;;  %s3253_s0 = sld [smem:[#allocation16_spill]] }
  0x7e   : > { %s435_s11 = scalar_lea.vmem [#allocation2], %s2023_s19  ;;  %p2967_p4 = pnand %p2323_p5, %p2936_p12 }
  0x7f   : > { %s442_s16 = sshll.u32 %s435_s11, 4  ;;  %s432_s13 = scalar_lea.sflag [#allocation3], %s431_s10  ;;  %s2963_s16 = int_to_ptr.vmem [resolvable:$true] %s442_s16 }
  0x80   : > { %p2595_p8 = pneg %p2967_p4 }
  0x83   : > { %s2961_s8 = scalar_lea.hbm %s3253_s0, %s2024_s21  ;;  %s2598_s30 = scalar_lea.hbm %s3253_s0, 256 }
  0x84   : > { %s2593_s2 = scalar_lea.hbm %s2961_s8, 128  ;;  %p2599_p11 = scmp.lt.u32.totalorder %s2961_s8, %s3253_s0 }
  0x85   : > { %p2594_p10 = scmp.ne.s32.totalorder %s2961_s8, %s2593_s2  ;;  %p2600_p12 = scmp.lt.u32.totalorder %s2598_s30, %s2593_s2 }
  0x86   : > { %p2602_p0 = scmp.lt.u32.totalorder %s2593_s2, %s2961_s8 }
  0x87   : > { %p2596_p1 = pnand %p2595_p8, %p2594_p10  ;;  %p2601_p13 = por %p2600_p12, %p2599_p11 }
  0x89   : > { %p2597_p3 = pneg %p2596_p1  ;;  %p2603_p2 = por %p2602_p0, %p2601_p13 }
  0x8b   : > { %p2604_p5 = pnand %p2603_p2, %p2597_p3 }
  0x8d   : > { %2607 = shalt.err (!%p2604_p5)
}
  0x8e   : > { %s2608_s10 = scalar_lea.vmem %s2963_s16, 128  ;;  %s2709_s11 = smov [#allocation2]  }
  0x8f   : > { %p2609_p10 = scmp.ne.s32.totalorder %s2963_s16, %s2608_s10  ;;  %s2613_s19 = sshll.u32 %s2709_s11, 4  ;;  %s2614_s19 = int_to_ptr.vmem [resolvable:$false] %s2613_s19 }
  0x90   : > { %s2615_s21 = scalar_lea.vmem %s2614_s19, 256  ;;  %p2616_p7 = scmp.lt.s32.totalorder %s2963_s16, %s2614_s19 }
  0x91   : > { %p2611_p1 = pnand %p2609_p10, %p2595_p8  ;;  %p2617_p11 = scmp.lt.s32.totalorder %s2615_s21, %s2608_s10 }
  0x93   : > { %p2612_p9 = pneg %p2611_p1  ;;  %p2618_p12 = por %p2617_p11, %p2616_p7 }
  0x95   : > { %p2619_p13 = pnand %p2618_p12, %p2612_p9 }
  0x97   : > { %2622 = shalt.err (!%p2619_p13)
}
  0x98   : > { %2314 = dma.hbm_to_vmem [thread:$0]  (!%p2967_p4), %s2961_s8, 128, %s2963_s16, %s432_s13  }
  0x99   : > { %p3255_p3 = scmp.ne.s32.totalorder %s3244_s15, 0 }
  0x9a   : > { %s2999_s2 = sand.u32 (!%p3255_p3), 1, %s2689_s26  }
  0x9b   : > { %457 = sbr.rel (%p3255_p3) target bundleno = 3905 (0xf41), region = 72  ;;  %s2026_s30 = sshll.u32 (!%p3255_p3), %s2999_s2, 3 }
  0x9c   : > { %s460_s24 = scalar_lea.sflag (!%p3255_p3), [#allocation3], %s2999_s2  ;;  %s3005_s20 = scalar_lea.vmem (!%p3255_p3), [#allocation2], %s2026_s30 }
  0xa2   : > { %2668 = dma.done.wait (%p2942_p6), %s460_s24, 128  }
  0xa3   : > { %2670 = vsyncadd (%p2942_p6), %s460_s24, 4294967168  ;;  %p3256_p7 = scmp.eq.s32.totalorder %s2808_s14, 0 }
  0xa5   : > { %2672 = dma.done.wait (%p3256_p7), [#allocation6], 4096   ;;  %p3257_p9 = pmov %p3256_p7 }
  0xa6   : > { %p3258_p4 = pmov %p3256_p7 }
  0xa7   : > { %2674 = vsyncadd (%p3257_p9), [#allocation6], 4294963200 }
  0xa8   : > { %2676 = dma.done.wait (%p3258_p4), [#allocation9], 4096   ;;  %p3259_p8 = pmov %p3258_p4 }
  0xa9   : > { %v2710_v0 = vmov 0   ;;  %v2377_v1 = vld [vmem:[#allocation5 + $0x4] ss:$12 sps:$4 sm:$0xff]   ;;  %v2379_v2 = vld [vmem:[#allocation5] ss:$12 sps:$4 sm:$0xff]   ;;  %v2711_v19 = vmov 0.0  }
  0xaa   : > { %2678 = vsyncadd (%p3259_p8), [#allocation9], 4294963200  ;;  %724 = vmatprep.mubr.bf16.mxu0 %v2710_v0  ;;  %692 = vmatprep.subr.bf16.mxu0 %v2377_v1  ;;  %v2380_v3 = vld [vmem:[#allocation5 + $0x1c] ss:$12 sps:$4 sm:$0xff]   ;;  %v2382_v4 = vld [vmem:[#allocation5 + $0x18] ss:$12 sps:$4 sm:$0xff]  }
  0xab   : > { %693 = vmatpush1.bf16.msra.mxu0 %v2379_v2  ;;  %v2383_v5 = vld [vmem:[#allocation5 + $0x34] ss:$12 sps:$4 sm:$0xff]   ;;  %v2385_v6 = vld [vmem:[#allocation5 + $0x30] ss:$12 sps:$4 sm:$0xff]   ;;  %v2386_v7 = vld [vmem:[#allocation5 + $0x4c] ss:$12 sps:$4 sm:$0xff]   ;;  %2178 = vmatprep.subr.bf16.mxu1 %v2711_v19 }
  0xac   : > { %694 = vmatprep.subr.bf16.mxu0 %v2380_v3  ;;  %v2388_v8 = vld [vmem:[#allocation5 + $0x48] ss:$12 sps:$4 sm:$0xff]   ;;  %v2389_v9 = vld [vmem:[#allocation5 + $0x64] ss:$12 sps:$4 sm:$0xff]   ;;  %v2391_v10 = vld [vmem:[#allocation5 + $0x60] ss:$12 sps:$4 sm:$0xff]  }
  0xad   : > { %v2392_v11 = vld [vmem:[#allocation5 + $0x7c] ss:$12 sps:$4 sm:$0xff]   ;;  %v2394_v12 = vld [vmem:[#allocation5 + $0x78] ss:$12 sps:$4 sm:$0xff]   ;;  %v2395_v13 = vld [vmem:[#allocation5 + $0x94] ss:$12 sps:$4 sm:$0xff]  }
  0xae   : > { %v2397_v14 = vld [vmem:[#allocation5 + $0x90] ss:$12 sps:$4 sm:$0xff]   ;;  %v2398_v15 = vld [vmem:[#allocation5 + $0xac] ss:$12 sps:$4 sm:$0xff]   ;;  %v2400_v16 = vld [vmem:[#allocation5 + $0xa8] ss:$12 sps:$4 sm:$0xff]  }
  0xaf   : > { %695 = vmatpush1.bf16.msra.mxu0 %v2382_v4  ;;  %v3021_v17 = vld [vmem:[%s3005_s20] sm:$0xff]  ;;  %vm2712_vm0 = vmmov 0   ;;  %vm776_vm1 = vcmask 261120   ;;  %s2713_s15 = smov 96   ;;  %v2402_v28 = vld [vmem:[#allocation5 + $0x20] ss:$12 sps:$4 sm:$0xff]  }
  0xb0   : > { %696 = vmatprep.subr.bf16.mxu0 %v2383_v5  ;;  %v531_v18 = vpack.c.bf16 %v3021_v17, %v3021_v17  ;;  %2194 = vmatprep.mubr.msk.bf16.mxu1 %vm2712_vm0, %v2711_v19  ;;  %v2401_v27 = vld [vmem:[#allocation5 + $0x8] ss:$12 sps:$4 sm:$0xff]   ;;  %v2403_v29 = vld [vmem:[#allocation5 + $0x38] ss:$12 sps:$4 sm:$0xff]   ;;  %v2404_v30 = vld [vmem:[#allocation5 + $0x50] ss:$12 sps:$4 sm:$0xff]  }
  0xb1   : > { %2179 = vmatpush3.bf16.msra.mxu1 %v2401_v27  ;;  %v2405_v31 = vld [vmem:[#allocation5 + $0x68] ss:$12 sps:$4 sm:$0xff]   ;;  %v2406_v34 = vld [vmem:[#allocation5 + $0x80] ss:$12 sps:$4 sm:$0xff]   ;;  %v2407_v35 = vld [vmem:[#allocation5 + $0x98] ss:$12 sps:$4 sm:$0xff]  }
  0xb2   : > { %2180 = vmatprep.subr.bf16.mxu1 %v2711_v19  ;;  %v2408_v37 = vld [vmem:[#allocation5 + $0xb0] ss:$12 sps:$4 sm:$0xff]   ;;  %p525_p6 = scmp.lt.s32.totalorder %s2808_s14, 1  ;;  %vm831_vm2 = vcmask 64512   ;;  %s2714_s13 = smov 64   ;;  %vm847_vm3 = vcmask 1043456  }
  0xb3   : > { %697 = vmatpush1.bf16.msra.mxu0 %v2385_v6  ;;  %s2715_s10 = smov 32   ;;  %s3260_s16 = sld [smem:[#allocation18_spill]] }
  0xb4   : > { %698 = vmatprep.subr.bf16.mxu0 %v2386_v7  ;;  %s526_s17 = scalar_select %p525_p6, %s2808_s14, 1 }
  0xb5   : > { %2181 = vmatpush3.bf16.msra.mxu1 %v2402_v28  ;;  %s3262_s21 = sld [smem:[#allocation20_spill]]  ;;  %s524_s8 = scalar_lea.vmem [#allocation11], %s2026_s30 }
  0xb6   : > { %2182 = vmatprep.subr.bf16.mxu1 %v2711_v19  ;;  %s527_s12 = scalar_lea.vmem %s3220_s1, %s526_s17  ;;  %s2116_s17 = sshll.u32 %s2808_s14, 7 }
  0xb7   : > { %699 = vmatpush1.bf16.msra.mxu0 %v2388_v8  ;;  %v3066_v39 = vld [vmem:[%s527_s12] ss:$0 sm:$0xff]  ;;  %s1886_s11 = scalar_lea.sflag [#allocation4], %s2999_s2  ;;  %p3265_p2 = scmp.ne.s32.totalorder %s3251_s22, 0 }
  0xb8   : > { %700 = vmatprep.subr.bf16.mxu0 %v2389_v9  ;;  %s2716_s14 = smov [#allocation11]  }
  0xb9   : > { %2183 = vmatpush3.bf16.msra.mxu1 %v2403_v29  ;;  %s2627_s30 = sshll.u32 %s2716_s14, 4  ;;  %s2628_s30 = int_to_ptr.vmem [resolvable:$false] %s2627_s30 }
  0xba   : > { %2184 = vmatprep.subr.bf16.mxu1 %v2711_v19 }
  0xbb   : > { %701 = vmatpush1.bf16.msra.mxu0 %v2391_v10  ;;  %v2411_v10 = vld [vmem:[#allocation7 + $0x10] sm:$0xff]  }
  0xbc   : > { %702 = vmatprep.subr.bf16.mxu0 %v2392_v11  ;;  %v2412_v11 = vld [vmem:[#allocation7 + $0x18] sm:$0xff]  }
  0xbd   : > { %2185 = vmatpush3.bf16.msra.mxu1 %v2404_v30 }
  0xbe   : > { %2186 = vmatprep.subr.bf16.mxu1 %v2711_v19 }
  0xbf   : > { %703 = vmatpush1.bf16.msra.mxu0 %v2394_v12 }
  0xc0   : > { %704 = vmatprep.subr.bf16.mxu0 %v2395_v13 }
  0xc1   : > { %2187 = vmatpush3.bf16.msra.mxu1 %v2405_v31 }
  0xc2   : > { %2188 = vmatprep.subr.bf16.mxu1 %v2711_v19 }
  0xc3   : > { %705 = vmatpush1.bf16.msra.mxu0 %v2397_v14 }
  0xc4   : > { %706 = vmatprep.subr.bf16.mxu0 %v2398_v15 }
  0xc5   : > { %2189 = vmatpush3.bf16.msra.mxu1 %v2406_v34 }
  0xc6   : > { %2190 = vmatprep.subr.bf16.mxu1 %v2711_v19 }
  0xc7   : > { %707 = vmatpush1.bf16.msra.mxu0 %v2400_v16 }
  0xc8   : > { %2198 = vmatprep.subr.bf16.mxu0 %v2711_v19 }
  0xc9   : > { %2191 = vmatpush3.bf16.msra.mxu1 %v2407_v35 }
  0xca   : > { %725 = vmatmul.mubr.bf16.vlgmr.msra.gmra.mrb[0].mxu0 %v531_v18  ;;  %2192 = vmatprep.subr.bf16.mxu1 %v2711_v19 }
  0xcb   : > { %2200 = vmatprep.mubr.msk.bf16.mxu0 %vm2712_vm0, %v2711_v19 }
  0xcd   : > { %2193 = vmatpush3.bf16.msra.mxu1 %v2408_v37 }
  0xce   : > { %2204 = vmatprep.subr.bf16.mxu1 %v2711_v19 }
  0xd0   : > { %2195 = vmatmul.mubr.bf16.vlgmr.msra.gmra.mrb[0].mxu1 %v531_v18  ;;  %v2409_v18 = vld [vmem:[#allocation7] sm:$0xff]  }
  0xd1   : > { %2206 = vmatprep.mubr.msk.bf16.mxu1 %vm2712_vm0, %v2711_v19 }
 0x19d   : > { %v726_v20 = vpop.f32.mrb[0].mxu0 }
 0x19e   : > { %v728_v21 = vpop.f32.mrb[1].mxu0  ;;  %v3037_v26 = vpack.c.bf16 %v726_v20, %v726_v20 }
 0x19f   : > { %v3031_v22 = vpack.c.bf16 %v728_v21, %v728_v21  ;;  %v730_v23 = vpop.f32.mrb[2].mxu0  ;;  %v2410_v21 = vld [vmem:[#allocation7 + $0x8] sm:$0xff]  }
 0x1a0   : > { %v731_v24 = vpop.f32.mrb[3].mxu0 }
 0x1a1   : > { %900 = vrot.lane.b32.xlu0 %v3031_v22, %s2713_s15  ;;  %v781_v25 = vsel %vm776_vm1, %v3031_v22, 0 }
 0x1a2   : > { %2199 = vmatpush3.bf16.xpose.msra.mxu0 %v781_v25 }
 0x1a3   : > { %2210 = vmatprep.subr.bf16.mxu0 %v2711_v19  ;;  %v767_v56 = vpop.f32.mrb[0].mxu1 }
 0x1a4   : > { %v2196_v57 = vpop.f32.mrb[1].mxu1  ;;  %v3073_v62 = vpack.c.bf16 %v767_v56, %v767_v56 }
 0x1a5   : > { %897 = vrot.lane.b32.xlu0 %v3037_v26, %s2713_s15  ;;  %v770_v58 = vpop.f32.mrb[2].mxu1 }
 0x1a6   : > { %v2197_v59 = vpop.f32.mrb[3].mxu1  ;;  %v849_v63 = vsel %vm847_vm3, %v3073_v62, 0 }
 0x1a7   : > { %2205 = vmatpush3.bf16.msra.mxu1 %v849_v63 }
 0x1a8   : > { %2216 = vmatprep.subr.bf16.mxu1 %v2711_v19 }
 0x1a9   : > { %2201 = vmatmul.mubr.msk.bf16.vlgmr.msra.gmra.mrb[4].mxu0 %vm776_vm1, %v3037_v26 }
 0x1aa   : > { %2212 = vmatprep.mubr.msk.bf16.mxu0 %vm2712_vm0, %v2711_v19 }
 0x213   : > { %v901_v32 = vpop.permute.xlu0 %900 }
 0x214   : > { %v906_v33 = vsel %vm776_vm1, %v901_v32, 0 }
 0x215   : > { %2211 = vmatpush3.bf16.xpose.msra.mxu0 %v906_v33 }
 0x216   : > { %2222 = vmatprep.subr.bf16.mxu0 %v2711_v19 }
 0x217   : > { %v898_v36 = vpop.permute.xlu0 %897 }
 0x21c   : > { %2213 = vmatmul.mubr.msk.bf16.vlgmr.msra.gmra.mrb[8].mxu0 %vm776_vm1, %v898_v36 }
 0x21d   : > { %2226 = vmatprep.mubr.msk.bf16.mxu0 %vm2712_vm0, %v2711_v19  ;;  %2223 = vmatpush3.bf16.msra.mxu0 %v2411_v10 }
 0x21e   : > { %2224 = vmatprep.subr.bf16.mxu0 %v2711_v19 }
 0x221   : > { %2225 = vmatpush3.bf16.msra.mxu0 %v2412_v11 }
 0x222   : > { %2238 = vmatprep.subr.bf16.mxu0 %v2711_v19 }
 0x27c   : > { %v817_v38 = vpop.f32.mrb[4].mxu0 }
 0x27d   : > { %v823_v40 = vmul.f32 0.17677669, %v817_v38  ;;  %v2202_v41 = vpop.f32.mrb[5].mxu0 }
 0x27e   : > { %v820_v42 = vpop.f32.mrb[6].mxu0 }
 0x27f   : > { %v2203_v43 = vpop.f32.mrb[7].mxu0  ;;  %v830_v44 = vadd.f32 %v3066_v39, %v823_v40 }
 0x281   : > { %v832_v45 = vsel %vm831_vm2, %v830_v44, -inf }
 0x282   : > { %833 = vmax.xlane.f32.xlu1 %v832_v45 }
 0x2ef   : > { %v942_v46 = vpop.f32.mrb[8].mxu0 }
 0x2f0   : > { %v948_v47 = vmul.f32 0.17677669, %v942_v46  ;;  %v2214_v48 = vpop.f32.mrb[9].mxu0 }
 0x2f1   : > { %v945_v49 = vpop.f32.mrb[10].mxu0 }
 0x2f2   : > { %v2215_v50 = vpop.f32.mrb[11].mxu0  ;;  %v949_v51 = vadd.f32 %v3066_v39, %v948_v47 }
 0x2f4   : > { %v950_v52 = vsel %vm831_vm2, %v949_v51, -inf }
 0x2f5   : > { %951 = vmax.xlane.f32.xlu1 %v950_v52 }
 0x30f   : > { %v834_v53 = vpop.xlane.xlu1 %833 }
 0x310   : > { %v835_v54 = vsub.f32 %v830_v44, %v834_v53 }
 0x312   : > { %v836_v55 = vmul.f32 1.442695, %v835_v54 }
 0x314   : > { %2457 = vpow2.f32 %v836_v55 }
 0x31e   : > { %v2458_v60 = vpop.eup %2457 }
 0x31f   : > { %v838_v61 = vsel %vm831_vm2, %v2458_v60, 0.0 }
 0x320   : > { %839 = vadd.xlane.f32.xlu0 %v838_v61  ;;  %v2413_v61 = vld [vmem:[#allocation7 + $0x20] sm:$0xff]  }
 0x336   : > { %1191 = vrot.lane.b32.xlu0 %v3073_v62, %s2714_s13 }
 0x382   : > { %v952_v1 = vpop.xlane.xlu1 %951 }
 0x383   : > { %v953_v2 = vsub.f32 %v949_v51, %v952_v1 }
 0x385   : > { %v954_v3 = vmul.f32 1.442695, %v953_v2 }
 0x387   : > { %2459 = vpow2.f32 %v954_v3 }
 0x391   : > { %v2460_v4 = vpop.eup %2459 }
 0x392   : > { %v956_v5 = vsel %vm831_vm2, %v2460_v4, 0.0 }
 0x393   : > { %957 = vadd.xlane.f32.xlu1 %v956_v5 }
 0x3a4   : > { %963 = vrot.lane.b32.xlu1 %v3073_v62, %s2713_s15  ;;  %s3263_s15 = sld [smem:[#allocation21_spill]] }
 0x3a8   : > { %1129 = vrot.lane.b32.xlu1 %v3031_v22, %s2714_s13 }
 0x3ac   : > { %1127 = vrot.lane.b32.xlu1 %v3037_v26, %s2714_s13 }
 0x3ad   : > { %v840_v6 = vpop.xlane.xlu0 %839 }
 0x3ae   : > { %2461 = vrcp.f32 %v840_v6 }
 0x3b1   : > { %v1192_v23 = vpop.permute.xlu0 %1191 }
 0x3b2   : > { %v1197_v29 = vsel %vm847_vm3, %v1192_v23, 0 }
 0x3b8   : > { %v2462_v7 = vpop.eup %2461 }
 0x3b9   : > { %v842_v8 = vmul.f32 %v2462_v7, %v2458_v60 }
 0x3bb   : > { %v843_v9 = vpack.c.bf16 %v842_v8, %v842_v8 }
 0x3bd   : > { %2207 = vmatmul.mubr.msk.bf16.vlgmr.msra.gmra.mrb[4].mxu1 %vm831_vm2, %v843_v9 }
 0x3be   : > { %2218 = vmatprep.mubr.msk.bf16.mxu1 %vm2712_vm0, %v2711_v19 }
 0x420   : > { %v958_v12 = vpop.xlane.xlu1 %957 }
 0x421   : > { %2463 = vrcp.f32 %v958_v12 }
 0x424   : > { %v964_v13 = vpop.permute.xlu1 %963 }
 0x425   : > { %v969_v14 = vsel %vm847_vm3, %v964_v13, 0 }
 0x426   : > { %2217 = vmatpush3.bf16.msra.mxu1 %v969_v14 }
 0x427   : > { %2230 = vmatprep.subr.bf16.mxu1 %v2711_v19 }
 0x428   : > { %v1130_v31 = vpop.permute.xlu1 %1129 }
 0x429   : > { %v1135_v36 = vsel %vm776_vm1, %v1130_v31, 0 }
 0x42b   : > { %v2464_v15 = vpop.eup %2463 }
 0x42c   : > { %v960_v16 = vmul.f32 %v2464_v15, %v2460_v4  ;;  %v1128_v38 = vpop.permute.xlu1 %1127 }
 0x42e   : > { %v961_v20 = vpack.c.bf16 %v960_v16, %v960_v16 }
 0x430   : > { %2219 = vmatmul.mubr.msk.bf16.vlgmr.msra.gmra.mrb[8].mxu1 %vm831_vm2, %v961_v20 }
 0x431   : > { %2231 = vmatpush3.bf16.msra.mxu1 %v2409_v18  ;;  %2234 = vmatprep.mubr.msk.bf16.mxu1 %vm2712_vm0, %v2711_v19 }
 0x432   : > { %2232 = vmatprep.subr.bf16.mxu1 %v2711_v19 }
 0x435   : > { %2233 = vmatpush3.bf16.msra.mxu1 %v2410_v21 }
 0x436   : > { %2244 = vmatprep.subr.bf16.mxu1 %v2711_v19 }
 0x490   : > { %v885_v24 = vpop.f32.mrb[4].mxu1 }
 0x491   : > { %v891_v25 = vpack.c.bf16 %v885_v24, %v885_v24  ;;  %v2208_v27 = vpop.f32.mrb[5].mxu1 }
 0x492   : > { %v888_v28 = vpop.f32.mrb[6].mxu1  ;;  %v2415_v27 = vld [vmem:[#allocation7 + $0x30] sm:$0xff]  }
 0x493   : > { %v2209_v30 = vpop.f32.mrb[7].mxu1  ;;  %2235 = vmatmul.mubr.msk.bf16.vlgmr.msra.gmra.mrb[12].mxu1 %vm776_vm1, %v891_v25 }
 0x494   : > { %2245 = vmatpush3.bf16.msra.mxu1 %v1197_v29  ;;  %2246 = vmatprep.mubr.msk.bf16.mxu1 %vm2712_vm0, %v2711_v19 }
 0x495   : > { %2258 = vmatprep.subr.bf16.mxu1 %v2711_v19 }
 0x503   : > { %v1005_v32 = vpop.f32.mrb[8].mxu1 }
 0x504   : > { %v1011_v33 = vpack.c.bf16 %v1005_v32, %v1005_v32  ;;  %v2220_v34 = vpop.f32.mrb[9].mxu1 }
 0x505   : > { %v1008_v35 = vpop.f32.mrb[10].mxu1 }
 0x506   : > { %v2221_v37 = vpop.f32.mrb[11].mxu1  ;;  %2227 = vmatmul.mubr.msk.bf16.vlgmr.msra.gmra.mrb[12].mxu0 %vm776_vm1, %v1011_v33 }
 0x507   : > { %2239 = vmatpush3.bf16.xpose.msra.mxu0 %v1135_v36  ;;  %2240 = vmatprep.mubr.msk.bf16.mxu0 %vm2712_vm0, %v2711_v19 }
 0x508   : > { %2250 = vmatprep.subr.bf16.mxu0 %v2711_v19 }
 0x50e   : > { %2241 = vmatmul.mubr.msk.bf16.vlgmr.msra.gmra.mrb[16].mxu0 %vm776_vm1, %v1128_v38 }
 0x50f   : > { %2254 = vmatprep.mubr.msk.bf16.mxu0 %vm2712_vm0, %v2711_v19  ;;  %2251 = vmatpush3.bf16.msra.mxu0 %v2413_v61  ;;  %v2431_v61 = vld [vmem:[#allocation8 + $0x44] ss:$8 sps:$4 sm:$0xff]  }
 0x510   : > { %2252 = vmatprep.subr.bf16.mxu0 %v2711_v19 }
 0x566   : > { %v1121_v40 = vpop.f32.mrb[12].mxu1 }
 0x567   : > { %v2236_v41 = vpop.f32.mrb[13].mxu1 }
 0x568   : > { %v1124_v42 = vpop.f32.mrb[14].mxu1 }
 0x569   : > { %v2237_v43 = vpop.f32.mrb[15].mxu1 }
 0x5d9   : > { %v1066_v44 = vpop.f32.mrb[12].mxu0 }
 0x5da   : > { %v3109_v45 = vadd.f32 %v1121_v40, %v1066_v44  ;;  %v2228_v46 = vpop.f32.mrb[13].mxu0  ;;  %v2077_v44 = vld [vmem:[%s3223_s4] ss:$0 sm:$0xff] }
 0x5db   : > { %v1069_v47 = vpop.f32.mrb[14].mxu0 }
 0x5dc   : > { %v2229_v48 = vpop.f32.mrb[15].mxu0 }
 0x5e1   : > { %v1171_v49 = vpop.f32.mrb[16].mxu0 }
 0x5e2   : > { %v1177_v50 = vmul.f32 0.17677669, %v1171_v49  ;;  %v2242_v51 = vpop.f32.mrb[17].mxu0 }
 0x5e3   : > { %v1174_v52 = vpop.f32.mrb[18].mxu0 }
 0x5e4   : > { %v2243_v53 = vpop.f32.mrb[19].mxu0  ;;  %v1178_v54 = vadd.f32 %v3066_v39, %v1177_v50 }
 0x5e6   : > { %v1179_v55 = vsel %vm831_vm2, %v1178_v54, -inf }
 0x5e7   : > { %1180 = vmax.xlane.f32.xlu1 %v1179_v55  ;;  %v2417_v55 = vld [vmem:[#allocation8] ss:$8 sps:$4 sm:$0xff]  }
 0x674   : > { %v1181_v56 = vpop.xlane.xlu1 %1180 }
 0x675   : > { %v1182_v57 = vsub.f32 %v1178_v54, %v1181_v56  ;;  %v2419_v54 = vld [vmem:[#allocation8 + $0x4] ss:$8 sps:$4 sm:$0xff]   ;;  %v2422_v56 = vld [vmem:[#allocation8 + $0x14] ss:$8 sps:$4 sm:$0xff]  }
 0x677   : > { %v1183_v58 = vmul.f32 1.442695, %v1182_v57  ;;  %v2420_v57 = vld [vmem:[#allocation8 + $0x10] ss:$8 sps:$4 sm:$0xff]  }
 0x679   : > { %2465 = vpow2.f32 %v1183_v58  ;;  %v2425_v58 = vld [vmem:[#allocation8 + $0x24] ss:$8 sps:$4 sm:$0xff]  }
 0x683   : > { %v2466_v59 = vpop.eup %2465 }
 0x684   : > { %v1185_v60 = vsel %vm831_vm2, %v2466_v59, 0.0 }
 0x685   : > { %1186 = vadd.xlane.f32.xlu0 %v1185_v60  ;;  %v2426_v60 = vld [vmem:[#allocation8 + $0x30] ss:$8 sps:$4 sm:$0xff]  }
 0x69b   : > { %1303 = vrot.lane.b32.xlu0 %v3031_v22, %s2715_s10 }
 0x69f   : > { %1301 = vrot.lane.b32.xlu0 %v3037_v26, %s2715_s10  ;;  %v2414_v26 = vld [vmem:[#allocation7 + $0x28] sm:$0xff]  }
 0x6a0   : > { %2253 = vmatpush3.bf16.msra.mxu0 %v2414_v26  ;;  %v2441_v26 = vld [vmem:[#allocation10 + $0x40] sm:$0xff]  }
 0x6a1   : > { %2264 = vmatprep.subr.bf16.mxu0 %v2711_v19 }
 0x712   : > { %v1187_v63 = vpop.xlane.xlu0 %1186 }
 0x713   : > { %2467 = vrcp.f32 %v1187_v63  ;;  %v2429_v63 = vld [vmem:[#allocation8 + $0x40] ss:$8 sps:$4 sm:$0xff]  }
 0x716   : > { %v1304_v3 = vpop.permute.xlu0 %1303 }
 0x717   : > { %v1309_v5 = vsel %vm776_vm1, %v1304_v3, 0  ;;  %v2437_v3 = vld [vmem:[#allocation8 + $0x64] ss:$8 sps:$4 sm:$0xff]  }
 0x71a   : > { %v1302_v22 = vpop.permute.xlu0 %1301 }
 0x71d   : > { %v2468_v1 = vpop.eup %2467 }
 0x71e   : > { %v1189_v2 = vmul.f32 %v2468_v1, %v2466_v59  ;;  %v2423_v59 = vld [vmem:[#allocation8 + $0x20] ss:$8 sps:$4 sm:$0xff]   ;;  %v2434_v1 = vld [vmem:[#allocation8 + $0x54] ss:$8 sps:$4 sm:$0xff]  }
 0x720   : > { %v1190_v4 = vpack.c.bf16 %v1189_v2, %v1189_v2  ;;  %v2432_v2 = vld [vmem:[#allocation8 + $0x50] ss:$8 sps:$4 sm:$0xff]  }
 0x722   : > { %2247 = vmatmul.mubr.msk.bf16.vlgmr.msra.gmra.mrb[16].mxu1 %vm831_vm2, %v1190_v4  ;;  %v2435_v4 = vld [vmem:[#allocation8 + $0x60] ss:$8 sps:$4 sm:$0xff]  }
 0x723   : > { %2259 = vmatpush3.bf16.xpose.msra.mxu1 %v1309_v5  ;;  %2260 = vmatprep.mubr.msk.bf16.mxu1 %vm2712_vm0, %v2711_v19  ;;  %v2440_v5 = vld [vmem:[#allocation8 + $0x74] ss:$8 sps:$4 sm:$0xff]  }
 0x724   : > { %2270 = vmatprep.subr.bf16.mxu1 %v2711_v19 }
 0x72a   : > { %2261 = vmatmul.mubr.msk.bf16.vlgmr.msra.gmra.mrb[20].mxu1 %vm776_vm1, %v1302_v22  ;;  %v2438_v22 = vld [vmem:[#allocation8 + $0x70] ss:$8 sps:$4 sm:$0xff]  }
 0x72b   : > { %2274 = vmatprep.mubr.msk.bf16.mxu1 %vm2712_vm0, %v2711_v19  ;;  %2271 = vmatpush3.bf16.msra.mxu1 %v2415_v27 }
 0x72c   : > { %2272 = vmatprep.subr.bf16.mxu1 %v2711_v19 }
 0x7f5   : > { %v1233_v6 = vpop.f32.mrb[16].mxu1 }
 0x7f6   : > { %v1239_v7 = vpack.c.bf16 %v1233_v6, %v1233_v6  ;;  %v2248_v8 = vpop.f32.mrb[17].mxu1  ;;  %v2442_v6 = vld [vmem:[#allocation10] sm:$0xff]  }
 0x7f7   : > { %v1236_v9 = vpop.f32.mrb[18].mxu1  ;;  %v2444_v8 = vld [vmem:[#allocation10 + $0x8] sm:$0xff]  }
 0x7f8   : > { %v2249_v10 = vpop.f32.mrb[19].mxu1  ;;  %2255 = vmatmul.mubr.msk.bf16.vlgmr.msra.gmra.mrb[20].mxu0 %vm776_vm1, %v1239_v7  ;;  %v2443_v7 = vld [vmem:[#allocation10 + $0x48] sm:$0xff]   ;;  %v2445_v9 = vld [vmem:[#allocation10 + $0x50] sm:$0xff]  }
 0x7f9   : > { %2266 = vmatprep.mubr.msk.bf16.mxu0 %vm2712_vm0, %v2711_v19  ;;  %v2416_v19 = vld [vmem:[#allocation7 + $0x38] sm:$0xff]   ;;  %v2446_v10 = vld [vmem:[#allocation10 + $0x10] sm:$0xff]  }
 0x7fa   : > { %2273 = vmatpush3.bf16.msra.mxu1 %v2416_v19  ;;  %v2456_v19 = vld [vmem:[#allocation10 + $0x38] sm:$0xff]  }
 0x7fb   : > { %2156 = vmatprep.subr.bf16.mxu1 %v2441_v26 }
 0x7fd   : > { %v1345_v11 = vpop.f32.mrb[20].mxu1 }
 0x7fe   : > { %v1351_v12 = vmul.f32 0.17677669, %v1345_v11  ;;  %v2262_v13 = vpop.f32.mrb[21].mxu1  ;;  %v2447_v11 = vld [vmem:[#allocation10 + $0x58] sm:$0xff]  }
 0x7ff   : > { %v1348_v14 = vpop.f32.mrb[22].mxu1  ;;  %v2449_v13 = vld [vmem:[#allocation10 + $0x60] sm:$0xff]  }
 0x800   : > { %v2263_v15 = vpop.f32.mrb[23].mxu1  ;;  %v1352_v16 = vadd.f32 %v3066_v39, %v1351_v12  ;;  %v2448_v12 = vld [vmem:[#allocation10 + $0x18] sm:$0xff]   ;;  %v2450_v14 = vld [vmem:[#allocation10 + $0x20] sm:$0xff]  }
 0x801   : > { %v2451_v15 = vld [vmem:[#allocation10 + $0x68] sm:$0xff]  }
 0x802   : > { %v1353_v18 = vsel %vm831_vm2, %v1352_v16, -inf }
 0x803   : > { %1354 = vmax.xlane.f32.xlu0 %v1353_v18 }
 0x890   : > { %v1355_v20 = vpop.xlane.xlu0 %1354 }
 0x891   : > { %v1356_v21 = vsub.f32 %v1352_v16, %v1355_v20  ;;  %v2452_v16 = vld [vmem:[#allocation10 + $0x28] sm:$0xff]  }
 0x893   : > { %v1357_v23 = vmul.f32 1.442695, %v1356_v21 }
 0x895   : > { %2469 = vpow2.f32 %v1357_v23 }
 0x89f   : > { %v2470_v24 = vpop.eup %2469 }
 0x8a0   : > { %v1359_v25 = vsel %vm831_vm2, %v2470_v24, 0.0 }
 0x8a1   : > { %1360 = vadd.xlane.f32.xlu1 %v1359_v25 }
 0x8b2   : > { %1365 = vrot.lane.b32.xlu1 %v3073_v62, %s2715_s10  ;;  %s3261_s10 = sld [smem:[#allocation19_spill]] }
 0x8cb   : > { %v1294_v28 = vpop.f32.mrb[20].mxu0 }
 0x8cc   : > { %v1300_v39 = vadd.f32 %v1294_v28, %v3109_v45  ;;  %v2256_v29 = vpop.f32.mrb[21].mxu0 }
 0x8cd   : > { %v1297_v30 = vpop.f32.mrb[22].mxu0  ;;  %v2078_v29 = vld [vmem:[%s3224_s5] ss:$0 sm:$0xff] }
 0x8ce   : > { %v2257_v31 = vpop.f32.mrb[23].mxu0 }
 0x8cf   : > { %v2079_v31 = vld [vmem:[%s3225_s6] ss:$0 sm:$0xff] }
 0x92e   : > { %v1361_v32 = vpop.xlane.xlu1 %1360 }
 0x92f   : > { %2471 = vrcp.f32 %v1361_v32 }
 0x932   : > { %v1366_v33 = vpop.permute.xlu1 %1365 }
 0x933   : > { %v1371_v34 = vsel %vm847_vm3, %v1366_v33, 0 }
 0x934   : > { %2265 = vmatpush3.bf16.msra.mxu0 %v1371_v34 }
 0x935   : > { %1629 = vmatprep.subr.bf16.mxu0 %v2419_v54 }
 0x939   : > { %v2472_v35 = vpop.eup %2471 }
 0x93a   : > { %v1363_v36 = vmul.f32 %v2472_v35, %v2470_v24  ;;  %v2453_v35 = vld [vmem:[#allocation10 + $0x70] sm:$0xff]  }
 0x93c   : > { %v1364_v37 = vpack.c.bf16 %v1363_v36, %v1363_v36  ;;  %v2454_v36 = vld [vmem:[#allocation10 + $0x30] sm:$0xff]  }
 0x93e   : > { %2267 = vmatmul.mubr.msk.bf16.vlgmr.msra.gmra.mrb[24].mxu0 %vm831_vm2, %v1364_v37  ;;  %v2455_v37 = vld [vmem:[#allocation10 + $0x78] sm:$0xff]  }
 0x93f   : > { %1661 = vmatprep.mubr.bf16.mxu0 %v2710_v0  ;;  %1630 = vmatpush1.bf16.msra.mxu0 %v2417_v55  ;;  %v2096_v55 = vld [vmem:[%s3261_s10] ss:$0 sm:$0xff]  ;;  %s3264_s10 = sld [smem:[#allocation22_spill]] }
 0x940   : > { %1631 = vmatprep.subr.bf16.mxu0 %v2422_v56 }
 0x943   : > { %1632 = vmatpush1.bf16.msra.mxu0 %v2420_v57 }
 0x944   : > { %1633 = vmatprep.subr.bf16.mxu0 %v2425_v58 }
 0x945   : > { %s3175_s0 = scalar_lea.hbm %s3264_s10, %s2116_s17 }
 0x947   : > { %1634 = vmatpush1.bf16.msra.mxu0 %v2423_v59 }
 0xa11   : > { %v1407_v62 = vpop.f32.mrb[24].mxu0 }
 0xa12   : > { %v1413_v38 = vpack.c.bf16 %v1407_v62, %v1407_v62  ;;  %v2268_v40 = vpop.f32.mrb[25].mxu0  ;;  %v1539_v62 = vlaneseq }
 0xa13   : > { %v1410_v41 = vpop.f32.mrb[26].mxu0 }
 0xa14   : > { %v2269_v42 = vpop.f32.mrb[27].mxu0  ;;  %2275 = vmatmul.mubr.msk.bf16.vlgmr.msra.gmra.mrb[24].mxu1 %vm776_vm1, %v1413_v38  ;;  %v1540_v38 = vshrl.u32 %v1539_v62, 7  ;;  %v1537_v41 = vld [vmem:[%s3260_s16] sm:$0x3]  ;;  %s1899_s16 = sshll.u32 %s524_s8, 4  ;;  %s3177_s16 = int_to_ptr.vmem [resolvable:$true] %s1899_s16 }
 0xa15   : > { %2157 = vmatpush3.bf16.msra.mxu1 %v2442_v6  ;;  %s2623_s19 = scalar_lea.vmem %s3177_s16, 128  ;;  %p2630_p1 = scmp.lt.s32.totalorder %s3177_s16, %s2628_s30 }
 0xa16   : > { %2158 = vmatprep.subr.bf16.mxu1 %v2443_v7  ;;  %v1541_v40 = vsub.s32 0, %v1540_v38  ;;  %v1545_v42 = vsub.s32 1, %v1540_v38  ;;  %p2624_p0 = scmp.ne.s32.totalorder %s3177_s16, %s2623_s19 }
 0xa18   : > { %p2625_p5 = pnand %p2624_p0, %p3265_p2 }
 0xa19   : > { %2159 = vmatpush3.bf16.msra.mxu1 %v2444_v8 }
 0xa1a   : > { %2160 = vmatprep.subr.bf16.mxu1 %v2445_v9  ;;  %p2626_p10 = pneg %p2625_p5 }
 0xa1d   : > { %2161 = vmatpush3.bf16.msra.mxu1 %v2446_v10  ;;  %v2113_v10 = vld [vmem:[%s3262_s21] ss:$0 sm:$0xff]  ;;  %s2629_s21 = scalar_lea.vmem %s2628_s30, 256 }
 0xa1e   : > { %2162 = vmatprep.subr.bf16.mxu1 %v2447_v11  ;;  %p2631_p11 = scmp.lt.s32.totalorder %s2629_s21, %s2623_s19 }
 0xa20   : > { %p2632_p12 = por %p2631_p11, %p2630_p1 }
 0xa21   : > { %2163 = vmatpush3.bf16.msra.mxu1 %v2448_v12  ;;  %v2114_v12 = vld [vmem:[%s3263_s15] ss:$0 sm:$0xff] }
 0xa22   : > { %2164 = vmatprep.subr.bf16.mxu1 %v2449_v13  ;;  %p2633_p13 = pnand %p2632_p12, %p2626_p10 }
 0xa25   : > { %2165 = vmatpush3.bf16.msra.mxu1 %v2450_v14 }
 0xa26   : > { %2166 = vmatprep.subr.bf16.mxu1 %v2451_v15 }
 0xa29   : > { %2167 = vmatpush3.bf16.msra.mxu1 %v2452_v16 }
 0xa2a   : > { %2168 = vmatprep.subr.bf16.mxu1 %v2453_v35 }
 0xa2d   : > { %2169 = vmatpush3.bf16.msra.mxu1 %v2454_v36 }
 0xa2e   : > { %2170 = vmatprep.subr.bf16.mxu1 %v2455_v37 }
 0xa31   : > { %2171 = vmatpush3.bf16.msra.mxu1 %v2456_v19 }
 0xae7   : > { %v1468_v43 = vpop.f32.mrb[24].mxu1 }
 0xae8   : > { %v1474_v45 = vadd.f32 %v1468_v43, %v1300_v39  ;;  %v2276_v46 = vpop.f32.mrb[25].mxu1  ;;  %v1542_v43 = vrot.slane %v1537_v41, %v1541_v40 }
 0xae9   : > { %v1471_v47 = vpop.f32.mrb[26].mxu1 }
 0xaea   : > { %v1482_v48 = vadd.f32 %v2077_v44, %v1474_v45  ;;  %v2277_v49 = vpop.f32.mrb[27].mxu1  ;;  %v1546_v44 = vrot.slane %v1537_v41, %v1545_v42 }
 0xaec   : > { %v1483_v0 = vadd.f32 %v1482_v48, %v3021_v17  ;;  %v2428_v17 = vld [vmem:[#allocation8 + $0x34] ss:$8 sps:$4 sm:$0xff]  }
 0xaed   : > { %1635 = vmatprep.subr.bf16.mxu0 %v2428_v17 }
 0xaee   : > { %1486 = vadd.xlane.f32.xlu1 %v1483_v0  ;;  %1636 = vmatpush1.bf16.msra.mxu0 %v2426_v60 }
 0xaef   : > { %1637 = vmatprep.subr.bf16.mxu0 %v2431_v61 }
 0xaf2   : > { %1638 = vmatpush1.bf16.msra.mxu0 %v2429_v63 }
 0xaf3   : > { %1639 = vmatprep.subr.bf16.mxu0 %v2434_v1 }
 0xaf6   : > { %1640 = vmatpush1.bf16.msra.mxu0 %v2432_v2 }
 0xaf7   : > { %1641 = vmatprep.subr.bf16.mxu0 %v2437_v3 }
 0xafa   : > { %1642 = vmatpush1.bf16.msra.mxu0 %v2435_v4 }
 0xafb   : > { %1643 = vmatprep.subr.bf16.mxu0 %v2440_v5 }
 0xafe   : > { %1644 = vmatpush1.bf16.msra.mxu0 %v2438_v22 }
 0xb7b   : > { %v1487_v50 = vpop.xlane.xlu1 %1486 }
 0xb7c   : > { %v1489_v51 = vmul.f32 0.0078125, %v1487_v50 }
 0xb7e   : > { %v3146_v52 = vsub.f32 %v1483_v0, %v1489_v51 }
 0xb80   : > { %v1491_v53 = vmul.f32 %v3146_v52, %v3146_v52 }
 0xb82   : > { %1492 = vadd.xlane.f32.xlu0 %v1491_v53 }
 0xc0f   : > { %v1493_v18 = vpop.xlane.xlu0 %1492 }
 0xc10   : > { %v1495_v20 = vmul.f32 0.007874016, %v1493_v18 }
 0xc12   : > { %2473 = vrsqrt.f32 %v1495_v20  ;;  %vm1498_vm4 = vcmp.eq.f32.partialorder %v1495_v20, inf  ;;  %v1501_v24 = vand.u32 2147483648, %v1495_v20  ;;  %vm1500_vm5 = vcmp.eq.f32.partialorder %v1495_v20, 0.0 }
 0xc1c   : > { %v2474_v21 = vpop.eup %2473 }
 0xc1d   : > { %v1497_v23 = vmul.f32 %v2474_v21, %v1495_v20 }
 0xc1f   : > { %v1499_v25 = vsel %vm1498_vm4, %v1495_v20, %v1497_v23 }
 0xc20   : > { %v1502_v27 = vsel %vm1500_vm5, %v1501_v24, %v1499_v25 }
 0xc21   : > { %v1503_v28 = vadd.f32 0.001, %v1502_v27 }
 0xc23   : > { %2475 = vrcp.f32 %v1503_v28 }
 0xc2d   : > { %v2476_v39 = vpop.eup %2475 }
 0xc2e   : > { %v1505_v30 = vmul.f32 %v2476_v39, %v3146_v52 }
 0xc30   : > { %v1512_v32 = vmul.f32 %v2078_v29, %v1505_v30 }
 0xc32   : > { %v1519_v33 = vadd.f32 %v2079_v31, %v1512_v32 }
 0xc34   : > { %v1520_v34 = vpack.c.bf16 %v1519_v33, %v1519_v33 }
 0xc36   : > { %1662 = vmatmul.mubr.bf16.vlgmr.msra.gmra.mrb[28].mxu0 %v1520_v34 }
 0xd09   : > { %v1663_v45 = vpop.f32.mrb[28].mxu0 }
 0xd0a   : > { %v1664_v46 = vadd.f32 %v1663_v45, %v1542_v43  ;;  %v1665_v47 = vpop.f32.mrb[29].mxu0 }
 0xd0b   : > { %v1666_v48 = vadd.f32 %v1665_v47, %v1546_v44  ;;  %v1667_v49 = vpop.f32.mrb[30].mxu0 }
 0xd0c   : > { %v1670_v0 = vmax.f32 %v1664_v46, 0.0  ;;  %v1668_v50 = vpop.f32.mrb[31].mxu0 }
 0xd0d   : > { %v1671_v51 = vmax.f32 %v1666_v48, 0.0 }
 0xd0e   : > { %v1672_v53 = vpack.c.bf16 %v1670_v0, %v1670_v0 }
 0xd0f   : > { %v1673_v52 = vpack.c.bf16 %v1671_v51, %v1671_v51 }
 0xd11   : > { %1841 = vmatprep.mubr.bf16.mxu1 %v1673_v52 }
 0xd12   : > { %1842 = vmatmul.mubr.bf16.vlgmr.msra.gmra.mrb[28].mxu1 %v1672_v53 }
 0xde5   : > { %v2172_v54 = vpop.f32.mrb[28].mxu1 }
 0xde6   : > { %v2173_v56 = vpop.f32.mrb[29].mxu1 }
 0xde7   : > { %v2174_v57 = vadd.f32 %v2173_v56, %v2172_v54  ;;  %v2175_v58 = vpop.f32.mrb[30].mxu1 }
 0xde8   : > { %v2176_v59 = vpop.f32.mrb[31].mxu1 }
 0xde9   : > { %v1844_v17 = vadd.f32 %v2174_v57, %v2096_v55 }
 0xdeb   : > { %v1849_v60 = vadd.f32 %v1844_v17, %v1519_v33 }
 0xded   : > { %1852 = vadd.xlane.f32.xlu0 %v1849_v60 }
 0xe7a   : > { %v1853_v61 = vpop.xlane.xlu0 %1852 }
 0xe7b   : > { %v1854_v63 = vmul.f32 0.0078125, %v1853_v61 }
 0xe7d   : > { %v1855_v1 = vsub.f32 %v1849_v60, %v1854_v63 }
 0xe7f   : > { %v1856_v2 = vmul.f32 %v1855_v1, %v1855_v1 }
 0xe81   : > { %1857 = vadd.xlane.f32.xlu0 %v1856_v2 }
 0xf0e   : > { %v1858_v3 = vpop.xlane.xlu0 %1857 }
 0xf0f   : > { %v1859_v4 = vmul.f32 0.007874016, %v1858_v3 }
 0xf11   : > { %2477 = vrsqrt.f32 %v1859_v4  ;;  %vm1862_vm6 = vcmp.eq.f32.partialorder %v1859_v4, inf  ;;  %v1865_v26 = vand.u32 2147483648, %v1859_v4  ;;  %vm1864_vm7 = vcmp.eq.f32.partialorder %v1859_v4, 0.0 }
 0xf1b   : > { %v2478_v5 = vpop.eup %2477 }
 0xf1c   : > { %v1861_v22 = vmul.f32 %v2478_v5, %v1859_v4 }
 0xf1e   : > { %v1863_v6 = vsel %vm1862_vm6, %v1859_v4, %v1861_v22 }
 0xf1f   : > { %v1866_v7 = vsel %vm1864_vm7, %v1865_v26, %v1863_v6 }
 0xf20   : > { %v1867_v8 = vadd.f32 0.001, %v1866_v7 }
 0xf22   : > { %2479 = vrcp.f32 %v1867_v8 }
 0xf2c   : > { %v2480_v9 = vpop.eup %2479 }
 0xf2d   : > { %v1869_v11 = vmul.f32 %v2480_v9, %v1855_v1 }
 0xf2f   : > { %v1876_v13 = vmul.f32 %v2113_v10, %v1869_v11 }
 0xf31   : > { %v1883_v14 = vadd.f32 %v2114_v12, %v1876_v13 }
 0xf33   : > { %1884 = vst [vmem:[%s524_s8] sm:$0xff] %v1883_v14 }
 0xf34   : > { %2636 = shalt.err (!%p2633_p13)
}
 0xf35   : > { %s2637_s2 = scalar_lea.hbm %s3175_s0, 128  ;;  %s2641_s15 = scalar_lea.hbm %s3264_s10, 256 }
 0xf36   : > { %p2638_p3 = scmp.ne.s32.totalorder %s3175_s0, %s2637_s2  ;;  %p2642_p4 = scmp.lt.u32.totalorder %s3175_s0, %s3264_s10 }
 0xf37   : > { %p2643_p8 = scmp.lt.u32.totalorder %s2641_s15, %s2637_s2  ;;  %p2645_p0 = scmp.lt.u32.totalorder %s2637_s2, %s3175_s0 }
 0xf38   : > { %p2639_p7 = pnand %p2638_p3, %p3265_p2 }
 0xf39   : > { %p2644_p6 = por %p2643_p8, %p2642_p4 }
 0xf3a   : > { %p2640_p9 = pneg %p2639_p7 }
 0xf3b   : > { %p2646_p5 = por %p2645_p0, %p2644_p6 }
 0xf3d   : > { %p2647_p10 = pnand %p2646_p5, %p2640_p9 }
 0xf3f   : > { %2650 = shalt.err (!%p2647_p10)
}
 0xf40   : > { %2296 = dma.vmem_to_hbm [thread:$0]  (%p3265_p2), %s3177_s16, 128, %s3175_s0, %s1886_s11  }
 0xf41 PF: > { %s1911_s12 = sand.u32 1, %s2685_s25   ;;  %p3266_p1 = scmp.ne.s32.totalorder %s3252_s29, 0 }
 0xf42   : > { %p3267_p11 = scmp.ge.s32.totalorder %s2697_s28, 2  ;;  %s1912_s13 = scalar_lea.sflag [#allocation4], %s1911_s12 }
 0xf44   : > { %p2316_p12 = pnand %p3267_p11, %p3266_p1 }
 0xf46   : > { %2680 = dma.done.wait (!%p2316_p12), %s1912_s13, 128  }
 0xf47   : > { %2682 = vsyncadd (!%p2316_p12), %s1912_s13, 4294967168  ;;  %p28_p13 = scmp.ge.s32.totalorder %s2923_s18, 4   ;;  %s3268_s25 = smov %s2689_s26 }
 0xf48   : > { %s3269_s26 = smov %s2693_s27  ;;  %s3270_s27 = smov %s2934_s23 }
 0xf49   : > { %s3271_s28 = smov %s2923_s18  ;;  %30 = sbr.rel (!%p28_p13) target bundleno = 15 (0xf), region = 139 }
 0xf50   :  { %1917 = vsyncpa [#allocation3], 1 }
 0xf51   :  { %1919 = vsyncpa [#allocation3 + $0x1], 1 }
 0xf52   :  { %1920 = vsyncpa [#allocation6], 1 }
 0xf53   :  { %1921 = vsyncpa [#allocation9], 1 }
 0xf54   :  { %1922 = vsyncpa [#allocation4], 1 }
 0xf55   :  { %1924 = vsyncpa [#allocation4 + $0x1], 1 }

</bundles_post_ra>
